<compile_context>
chip_gen: v5e
topology: v5e:2x2
jax: 0.10.0
libtpu: 0.0.40
codegen_flags: <defaults>
</compile_context>

<pallas_src>
import functools

import numpy as np
import jax
import jax.numpy as jnp
from jax import lax
from jax.experimental import pallas as pl
from jax.experimental.pallas import tpu as pltpu


def _round_up(x, m):
    return ((x + m - 1) // m) * m


# ----------------------------- Pallas kernel -------------------------------
def _make_func_gru_kernel(T, TB, Hp, L):
    """Fused multi-layer GRU kernel for one batch tile; static (T, TB, Hp, L)."""
    H3 = 3 * Hp

    def kernel(max_lens_ref,                                   # SMEM (num_tiles,) int32
               x_ref, lens_ref,
               wih0_ref, whh0_ref, bi0_ref, bhn0_ref,
               wihr_ref, whhr_ref, bir_ref, bhnr_ref,
               out_ref,
               gi_ref, act_ref, h_ref):
        # x_ref  : (T, TB, D)   embedded input (time-major), compute dtype
        # lens   : (TB, 1)      valid lengths (0 for padding rows)
        # layer 0 fused weights: (D,3Hp) (Hp,3Hp) (1,3Hp) (1,Hp)
        # layers 1..L-1 stacked: (Lr,Hp,3Hp) (Lr,Hp,3Hp) (Lr,1,3Hp) (Lr,1,Hp)
        # out_ref: (TB, Hp)     final-layer hidden state at t = len_b - 1
        # gi_ref : (T, TB, 3Hp) f32 scratch, hoisted input projection
        # act_ref: (T, TB, Hp)  scratch, inter-layer activations (compute dtype)
        # h_ref  : (TB, Hp)     f32 scratch, recurrent hidden state
        lens = lens_ref[...]                                   # (TB, 1) int32
        max_len = max_lens_ref[pl.program_id(0)]               # longest sequence in this tile
        out_ref[...] = jnp.zeros_like(out_ref)

        def run_layer(src_ref, wih, whh, bi, bhn, is_last):
            # ---- hoisted input projection: ONE big MXU matmul for all T steps ----
            K = src_ref.shape[-1]
            xw = src_ref[...].reshape(T * TB, K)
            gi_ref[...] = (jnp.dot(xw, wih, preferred_element_type=jnp.float32)
                           + bi).reshape(T, TB, H3)

            h_ref[...] = jnp.zeros_like(h_ref)

            # ---- serial recurrence: only the hidden matmul + gates remain per step ----
            # TODO(synk): on v5e/v6e at H>=128, hold whh in MXU weight regs across the T
            #             steps via pltpu.matmul_push_rhs/matmul_acc_lhs/matmul_pop.
            def body(t, carry):
                gi = gi_ref[t]                                             # (TB, 3Hp) f32
                h = h_ref[...]                                             # (TB, Hp)  f32
                gh = jnp.dot(h.astype(whh.dtype), whh,
                             preferred_element_type=jnp.float32)           # (TB, 3Hp) f32
                r = jax.nn.sigmoid(gi[:, 0:Hp] + gh[:, 0:Hp])
                z = jax.nn.sigmoid(gi[:, Hp:2 * Hp] + gh[:, Hp:2 * Hp])
                n = jnp.tanh(gi[:, 2 * Hp:H3] + r * (gh[:, 2 * Hp:H3] + bhn))
                h_new = n + z * (h - n)
                h_ref[...] = h_new
                if is_last:
                    # Capture the hidden state at each row's last valid timestep.
                    out_ref[...] = jnp.where(lens == t + 1, h_new, out_ref[...])
                else:
                    act_ref[t] = h_new.astype(act_ref.dtype)
                return carry

            lax.fori_loop(0, max_len, body, 0)

        # layer 0 reads the embedded input
        run_layer(x_ref, wih0_ref[...], whh0_ref[...], bi0_ref[...], bhn0_ref[...],
                  is_last=(L == 1))
        # layers 1..L-1: projection reads act fully BEFORE the recurrence rewrites it
        for l in range(1, L):
            run_layer(act_ref, wihr_ref[l - 1], whhr_ref[l - 1],
                      bir_ref[l - 1], bhnr_ref[l - 1], is_last=(l == L - 1))

    return kernel


# --------------------------- param fusion helpers ----------------------------
def _pad_last(a, n):
    return jnp.pad(a, [(0, 0)] * (a.ndim - 1) + [(0, n - a.shape[-1])])


def _pad_2nd_last(a, n):
    pad = [(0, 0)] * a.ndim
    pad[-2] = (0, n - a.shape[-2])
    return jnp.pad(a, pad)


def _fuse_layer(layer, in_pad, Hp):
    """Per-gate (3,K,H)/(3,H,H)/(3,1,H) -> fused, lane-aligned (in_pad,3Hp)/(Hp,3Hp)/(1,3Hp)/(1,Hp)."""
    w_ih = jnp.concatenate(
        [_pad_last(_pad_2nd_last(layer["w_ih"][g], in_pad), Hp) for g in range(3)], axis=-1)
    w_hh = jnp.concatenate(
        [_pad_last(_pad_2nd_last(layer["w_hh"][g], Hp), Hp) for g in range(3)], axis=-1)
    # Pre-fold r/z biases; n keeps b_hn separate (n = tanh(Wx + b_in + r*(Wh h + b_hn))).
    b_i = jnp.concatenate(
        [_pad_last(layer["b_ih"][0] + layer["b_hh"][0], Hp),
         _pad_last(layer["b_ih"][1] + layer["b_hh"][1], Hp),
         _pad_last(layer["b_ih"][2], Hp)], axis=-1)
    b_hn = _pad_last(layer["b_hh"][2], Hp)
    return w_ih, w_hh, b_i, b_hn


def _fuse_params(params, Hp, w_dtype):
    layers = params["gru_layers"]
    L = len(layers)
    D = layers[0]["w_ih"].shape[1]
    wih0, whh0, bi0, bhn0 = _fuse_layer(layers[0], D, Hp)
    if L > 1:
        rest = [_fuse_layer(l, Hp, Hp) for l in layers[1:]]
        wihr = jnp.stack([r[0] for r in rest])     # (L-1, Hp, 3Hp)
        whhr = jnp.stack([r[1] for r in rest])     # (L-1, Hp, 3Hp)
        bir = jnp.stack([r[2] for r in rest])      # (L-1, 1, 3Hp)
        bhnr = jnp.stack([r[3] for r in rest])     # (L-1, 1, Hp)
    else:
        # Dummy (never read when L == 1) so pallas_call always gets non-empty arrays.
        wihr = jnp.zeros((1, Hp, 3 * Hp), jnp.float32)
        whhr = jnp.zeros((1, Hp, 3 * Hp), jnp.float32)
        bir = jnp.zeros((1, 1, 3 * Hp), jnp.float32)
        bhnr = jnp.zeros((1, 1, Hp), jnp.float32)
    # Weights in matmul (compute) dtype; biases stay f32 (added to f32 accumulations).
    return (wih0.astype(w_dtype), whh0.astype(w_dtype), bi0, bhn0,
            wihr.astype(w_dtype), whhr.astype(w_dtype), bir, bhnr)


# --------------------------- FuncGru forward --------------------------------
def func_gru_forward(params, node_tok_ids, node_lens, *, compute_dtype=jnp.bfloat16):
    """node_tok_ids: (B, T) int32, node_lens: (B,) int32 (>=1) -> (B, H) float32."""
    # Embedding gather + time-major transpose kept as XLA glue.
    # TODO(synk): fuse the embedding gather (pl.Element row-gather BlockSpec on token ids)
    #             and drop the transpose once T*B*D is large enough for the extra HBM pass
    #             to matter.
    emb = jnp.take(params["embedding"], node_tok_ids, axis=0)          # (B, T, D)
    x = jnp.transpose(emb, (1, 0, 2))                                  # (T, B, D)
    T, B, D = x.shape

    L = len(params["gru_layers"])
    H = params["gru_layers"][0]["w_hh"].shape[-1]
    Hp = _round_up(H, 128)                                             # lane-aligned gates
    is_bf16 = jnp.dtype(compute_dtype) == jnp.dtype(jnp.bfloat16)
    TB = 16 if is_bf16 else 8                                          # sublane-aligned tile
    B_pad = _round_up(B, TB)
    num_tiles = B_pad // TB

    x = jnp.pad(x, ((0, 0), (0, B_pad - B), (0, 0))).astype(compute_dtype)
    lens = jnp.pad(node_lens.astype(jnp.int32), (0, B_pad - B))        # padded rows: len 0
    lens2d = lens.reshape(B_pad, 1)
    max_lens = jnp.max(lens.reshape(num_tiles, TB), axis=1)            # per-tile trip bound

    wih0, whh0, bi0, bhn0, wihr, whhr, bir, bhnr = _fuse_params(params, Hp, compute_dtype)
    Lr = wihr.shape[0]

    kernel = _make_func_gru_kernel(T, TB, Hp, L)

    # Explicit VMEM budget: double-buffered input/output blocks + scratch + headroom.
    cds = jnp.dtype(compute_dtype).itemsize
    block_bytes = (T * TB * D * cds + TB * 4
                   + (D + Hp) * 3 * Hp * cds + (3 * Hp + Hp) * 4
                   + Lr * (2 * Hp * 3 * Hp * cds + (3 * Hp + Hp) * 4)
                   + TB * Hp * 4)
    scratch_bytes = T * TB * 3 * Hp * 4 + T * TB * Hp * cds + TB * Hp * 4
    vmem_limit = int(min(100 * 2 ** 20,
                         max(16 * 2 ** 20, 2 * block_bytes + scratch_bytes + 4 * 2 ** 20)))

    out = pl.pallas_call(
        kernel,
        out_shape=jax.ShapeDtypeStruct((B_pad, Hp), jnp.float32),
        grid_spec=pltpu.PrefetchScalarGridSpec(
            num_scalar_prefetch=1,
            grid=(num_tiles,),
            in_specs=[
                pl.BlockSpec((T, TB, D), lambda i, ml: (0, i, 0)),         # x (time-major)
                pl.BlockSpec((TB, 1), lambda i, ml: (i, 0)),               # lens
                pl.BlockSpec((D, 3 * Hp), lambda i, ml: (0, 0)),           # wih0
                pl.BlockSpec((Hp, 3 * Hp), lambda i, ml: (0, 0)),          # whh0
                pl.BlockSpec((1, 3 * Hp), lambda i, ml: (0, 0)),           # bi0
                pl.BlockSpec((1, Hp), lambda i, ml: (0, 0)),               # bhn0
                pl.BlockSpec((Lr, Hp, 3 * Hp), lambda i, ml: (0, 0, 0)),   # wihr
                pl.BlockSpec((Lr, Hp, 3 * Hp), lambda i, ml: (0, 0, 0)),   # whhr
                pl.BlockSpec((Lr, 1, 3 * Hp), lambda i, ml: (0, 0, 0)),    # bir
                pl.BlockSpec((Lr, 1, Hp), lambda i, ml: (0, 0, 0)),        # bhnr
            ],
            out_specs=pl.BlockSpec((TB, Hp), lambda i, ml: (i, 0)),
            scratch_shapes=[
                pltpu.VMEM((T, TB, 3 * Hp), jnp.float32),   # gi: hoisted input projection
                pltpu.VMEM((T, TB, Hp), compute_dtype),     # inter-layer activations
                pltpu.VMEM((TB, Hp), jnp.float32),          # recurrent hidden state
            ],
        ),
        compiler_params=pltpu.CompilerParams(
            dimension_semantics=("parallel",),
            vmem_limit_bytes=vmem_limit,
        ),
    )(max_lens, x, lens2d, wih0, whh0, bi0, bhn0, wihr, whhr, bir, bhnr)

    return out[:B, :H]


# --------------------------- pure-JAX reference ------------------------------
def gru_layer_ref(x_tbd, w_ih, w_hh, b_ih, b_hh):
    """Per-gate reference, exactly mirroring torch.nn.GRU math."""
    B = x_tbd.shape[1]
    H = w_hh.shape[-1]

    def step(h, x):
        gi_r = x @ w_ih[0] + b_ih[0]
        gi_z = x @ w_ih[1] + b_ih[1]
        gi_n = x @ w_ih[2] + b_ih[2]
        gh_r = h @ w_hh[0] + b_hh[0]
        gh_z = h @ w_hh[1] + b_hh[1]
        gh_n = h @ w_hh[2] + b_hh[2]
        r = jax.nn.sigmoid(gi_r + gh_r)
        z = jax.nn.sigmoid(gi_z + gh_z)
        n = jnp.tanh(gi_n + r * gh_n)
        h_new = (1.0 - z) * n + z * h
        return h_new, h_new

    h0 = jnp.zeros((B, H), jnp.float32)
    _, outs = lax.scan(step, h0, x_tbd)
    return outs


def func_gru_ref(params, node_tok_ids, node_lens):
    emb = jnp.take(params["embedding"], node_tok_ids, axis=0)
    x = jnp.transpose(emb, (1, 0, 2)).astype(jnp.float32)
    for layer in params["gru_layers"]:
        x = gru_layer_ref(x, layer["w_ih"], layer["w_hh"], layer["b_ih"], layer["b_hh"])
    B = node_tok_ids.shape[0]
    return x[node_lens - 1, jnp.arange(B), :]


# ------------------------------ param init ----------------------------------
def init_params(key, vocab_size, in_dims, out_dims, n_layers):
    keys = jax.random.split(key, 1 + 4 * n_layers)
    embedding = jax.random.normal(keys[0], (vocab_size, in_dims), jnp.float32) * 0.1
    layers = []
    bound = 1.0 / np.sqrt(out_dims)
    for l in range(n_layers):
        d_in = in_dims if l == 0 else out_dims
        k = keys[1 + 4 * l: 1 + 4 * (l + 1)]
        # PyTorch stores (3H, D); we store transposed per-gate: (3, D, H) / (3, H, H)
        w_ih = jax.random.uniform(k[0], (3, d_in, out_dims), jnp.float32, -bound, bound)
        w_hh = jax.random.uniform(k[1], (3, out_dims, out_dims), jnp.float32, -bound, bound)
        b_ih = jax.random.uniform(k[2], (3, 1, out_dims), jnp.float32, -bound, bound)
        b_hh = jax.random.uniform(k[3], (3, 1, out_dims), jnp.float32, -bound, bound)
        layers.append(dict(w_ih=w_ih, w_hh=w_hh, b_ih=b_ih, b_hh=b_hh))
    return dict(embedding=embedding, gru_layers=layers)


# --------------------------------- main --------------------------------------
if __name__ == "__main__":
    VOCAB, IN_DIMS, OUT_DIMS, N_LAYERS = 50, 32, 32, 2
    B, T = 4, 8

    key = jax.random.PRNGKey(0)
    k_param, k_tok = jax.random.split(key)
    params = init_params(k_param, VOCAB, IN_DIMS, OUT_DIMS, N_LAYERS)

    node_tok_ids = jax.random.randint(k_tok, (B, T), 0, VOCAB, dtype=jnp.int32)
    node_lens = jnp.array([8, 5, 7, 3], dtype=jnp.int32)   # valid lengths per sequence (>= 1)

    ref = jax.block_until_ready(func_gru_ref(params, node_tok_ids, node_lens))

    # Exactness check: f32 matmul path.
    fwd_f32 = jax.jit(functools.partial(func_gru_forward, compute_dtype=jnp.float32))
    out_f32 = jax.block_until_ready(fwd_f32(params, node_tok_ids, node_lens))
    np.testing.assert_allclose(np.asarray(out_f32), np.asarray(ref), rtol=1e-5, atol=2e-5)

    # Production path: bf16 matmul operands, f32 accumulation/gates.
    fwd_bf16 = jax.jit(func_gru_forward)
    out_bf16 = jax.block_until_ready(fwd_bf16(params, node_tok_ids, node_lens))
    np.testing.assert_allclose(np.asarray(out_bf16), np.asarray(ref), rtol=3e-2, atol=3e-2)

    assert out_bf16.shape == (B, OUT_DIMS)
    print("KERNEL_OK")
</pallas_src>

<mosaic_0001>
module attributes {stable_mosaic.version = 11 : i64} {
  func.func @kernel(%arg0: i32, %arg1: memref<1xi32, #tpu.memory_space<smem>>, %arg2: memref<8x8x32xf32, #tpu.memory_space<vmem>>, %arg3: memref<8x1xi32, #tpu.memory_space<vmem>>, %arg4: memref<32x384xf32, #tpu.memory_space<vmem>>, %arg5: memref<128x384xf32, #tpu.memory_space<vmem>>, %arg6: memref<1x384xf32, #tpu.memory_space<vmem>>, %arg7: memref<1x128xf32, #tpu.memory_space<vmem>>, %arg8: memref<1x128x384xf32, #tpu.memory_space<vmem>>, %arg9: memref<1x128x384xf32, #tpu.memory_space<vmem>>, %arg10: memref<1x1x384xf32, #tpu.memory_space<vmem>>, %arg11: memref<1x1x128xf32, #tpu.memory_space<vmem>>, %arg12: memref<8x128xf32, #tpu.memory_space<vmem>>, %arg13: memref<8x8x384xf32, #tpu.memory_space<vmem>>, %arg14: memref<8x8x128xf32, #tpu.memory_space<vmem>>, %arg15: memref<8x128xf32, #tpu.memory_space<vmem>>) attributes {dimension_semantics = [#tpu.dimension_semantics<parallel>], iteration_bounds = array<i64: 1>, scalar_prefetch = 1 : i64, scratch_operands = 3 : i64, tpu.core_type = #tpu.core_type<tc>, window_params = [{transform_indices = @transform_0, window_bounds = array<i64: 8, 8, 32>}, {transform_indices = @transform_1, window_bounds = array<i64: 8, 1>}, {pipeline_mode = #tpu.pipeline_mode<synchronous>, transform_indices = @transform_2, window_bounds = array<i64: 32, 384>}, {pipeline_mode = #tpu.pipeline_mode<synchronous>, transform_indices = @transform_3, window_bounds = array<i64: 128, 384>}, {pipeline_mode = #tpu.pipeline_mode<synchronous>, transform_indices = @transform_4, window_bounds = array<i64: 1, 384>}, {pipeline_mode = #tpu.pipeline_mode<synchronous>, transform_indices = @transform_5, window_bounds = array<i64: 1, 128>}, {pipeline_mode = #tpu.pipeline_mode<synchronous>, transform_indices = @transform_6, window_bounds = array<i64: 1, 128, 384>}, {pipeline_mode = #tpu.pipeline_mode<synchronous>, transform_indices = @transform_7, window_bounds = array<i64: 1, 128, 384>}, {pipeline_mode = #tpu.pipeline_mode<synchronous>, transform_indices = @transform_8, window_bounds = array<i64: 1, 1, 384>}, {pipeline_mode = #tpu.pipeline_mode<synchronous>, transform_indices = @transform_9, window_bounds = array<i64: 1, 1, 128>}, {transform_indices = @transform_10, window_bounds = array<i64: 8, 128>}]} {
    %c0 = arith.constant 0 : index
    %c0_0 = arith.constant 0 : index
    %0 = vector.load %arg3[%c0, %c0_0] : memref<8x1xi32, #tpu.memory_space<vmem>>, vector<8x1xi32>
    %1 = arith.index_cast %arg0 : i32 to index
    %2 = memref.load %arg1[%1] : memref<1xi32, #tpu.memory_space<smem>>
    %cst = arith.constant 0.000000e+00 : f32
    %3 = vector.broadcast %cst : f32 to vector<8x128xf32>
    %c0_1 = arith.constant 0 : index
    %c0_2 = arith.constant 0 : index
    %4 = vector.load %arg12[%c0_1, %c0_2] : memref<8x128xf32, #tpu.memory_space<vmem>>, vector<8x128xf32>
    tpu.vector_store %arg12[%c0_1, %c0_2], %3 {strides = array<i32>} : memref<8x128xf32, #tpu.memory_space<vmem>>, vector<8x128xf32>,
    %c0_3 = arith.constant 0 : index
    %c0_4 = arith.constant 0 : index
    %5 = vector.load %arg4[%c0_3, %c0_4] : memref<32x384xf32, #tpu.memory_space<vmem>>, vector<32x384xf32>
    %c0_5 = arith.constant 0 : index
    %c0_6 = arith.constant 0 : index
    %6 = vector.load %arg5[%c0_5, %c0_6] : memref<128x384xf32, #tpu.memory_space<vmem>>, vector<128x384xf32>
    %c0_7 = arith.constant 0 : index
    %c0_8 = arith.constant 0 : index
    %7 = vector.load %arg6[%c0_7, %c0_8] : memref<1x384xf32, #tpu.memory_space<vmem>>, vector<1x384xf32>
    %c0_9 = arith.constant 0 : index
    %c0_10 = arith.constant 0 : index
    %8 = vector.load %arg7[%c0_9, %c0_10] : memref<1x128xf32, #tpu.memory_space<vmem>>, vector<1x128xf32>
    %c0_11 = arith.constant 0 : index
    %c0_12 = arith.constant 0 : index
    %c0_13 = arith.constant 0 : index
    %9 = vector.load %arg2[%c0_11, %c0_12, %c0_13] : memref<8x8x32xf32, #tpu.memory_space<vmem>>, vector<8x8x32xf32>
    %10 = vector.shape_cast %9 : vector<8x8x32xf32> to vector<64x32xf32>
    %cst_14 = arith.constant dense<0.000000e+00> : vector<64x384xf32>
    %11 = tpu.matmul %10, %5, %cst_14 {dimension_numbers = #tpu.dot_dimension_numbers<[1], [0], [0], [1], [0, 0, 1, 1], [], []>} : vector<64x32xf32>, vector<32x384xf32>, vector<64x384xf32> -> vector<64x384xf32>
    %12 = vector.broadcast %7 : vector<1x384xf32> to vector<64x384xf32>
    %13 = arith.addf %11, %12 : vector<64x384xf32>
    %14 = vector.shape_cast %13 : vector<64x384xf32> to vector<8x8x384xf32>
    %c0_15 = arith.constant 0 : index
    %c0_16 = arith.constant 0 : index
    %c0_17 = arith.constant 0 : index
    %15 = vector.load %arg13[%c0_15, %c0_16, %c0_17] : memref<8x8x384xf32, #tpu.memory_space<vmem>>, vector<8x8x384xf32>
    tpu.vector_store %arg13[%c0_15, %c0_16, %c0_17], %14 {strides = array<i32>} : memref<8x8x384xf32, #tpu.memory_space<vmem>>, vector<8x8x384xf32>,
    %cst_18 = arith.constant 0.000000e+00 : f32
    %16 = vector.broadcast %cst_18 : f32 to vector<8x128xf32>
    %c0_19 = arith.constant 0 : index
    %c0_20 = arith.constant 0 : index
    %17 = vector.load %arg15[%c0_19, %c0_20] : memref<8x128xf32, #tpu.memory_space<vmem>>, vector<8x128xf32>
    tpu.vector_store %arg15[%c0_19, %c0_20], %16 {strides = array<i32>} : memref<8x128xf32, #tpu.memory_space<vmem>>, vector<8x128xf32>,
    %c0_i32 = arith.constant 0 : i32
    %c0_i32_21 = arith.constant 0 : i32
    %18 = arith.subi %2, %c0_i32_21 : i32
    %19 = arith.addi %c0_i32_21, %18 : i32
    %c1_i32 = arith.constant 1 : i32
    scf.for %arg16 = %c0_i32_21 to %19 step %c1_i32  : i32 {
      %39 = arith.index_cast %arg16 : i32 to index
      %c0_47 = arith.constant 0 : index
      %c0_48 = arith.constant 0 : index
      %40 = vector.load %arg13[%39, %c0_47, %c0_48] : memref<8x8x384xf32, #tpu.memory_space<vmem>>, vector<1x8x384xf32>
      %41 = vector.shape_cast %40 : vector<1x8x384xf32> to vector<8x384xf32>
      %c0_49 = arith.constant 0 : index
      %c0_50 = arith.constant 0 : index
      %42 = vector.load %arg15[%c0_49, %c0_50] : memref<8x128xf32, #tpu.memory_space<vmem>>, vector<8x128xf32>
      %cst_51 = arith.constant dense<0.000000e+00> : vector<8x384xf32>
      %43 = tpu.matmul %42, %6, %cst_51 {dimension_numbers = #tpu.dot_dimension_numbers<[1], [0], [0], [1], [0, 0, 1, 1], [], []>} : vector<8x128xf32>, vector<128x384xf32>, vector<8x384xf32> -> vector<8x384xf32>
      %44 = vector.extract_strided_slice %41 {offsets = [0, 0], sizes = [8, 128], strides = [1, 1]} : vector<8x384xf32> to vector<8x128xf32>
      %45 = vector.extract_strided_slice %43 {offsets = [0, 0], sizes = [8, 128], strides = [1, 1]} : vector<8x384xf32> to vector<8x128xf32>
      %46 = arith.addf %44, %45 : vector<8x128xf32>
      %47 = arith.negf %46 : vector<8x128xf32>
      %48 = math.exp %47 : vector<8x128xf32>
      %cst_52 = arith.constant 1.000000e+00 : f32
      %49 = vector.broadcast %cst_52 : f32 to vector<8x128xf32>
      %50 = arith.addf %49, %48 : vector<8x128xf32>
      %51 = arith.divf %49, %50 : vector<8x128xf32>
      %52 = vector.extract_strided_slice %41 {offsets = [0, 128], sizes = [8, 128], strides = [1, 1]} : vector<8x384xf32> to vector<8x128xf32>
      %53 = vector.extract_strided_slice %43 {offsets = [0, 128], sizes = [8, 128], strides = [1, 1]} : vector<8x384xf32> to vector<8x128xf32>
      %54 = arith.addf %52, %53 : vector<8x128xf32>
      %55 = arith.negf %54 : vector<8x128xf32>
      %56 = math.exp %55 : vector<8x128xf32>
      %cst_53 = arith.constant 1.000000e+00 : f32
      %57 = vector.broadcast %cst_53 : f32 to vector<8x128xf32>
      %58 = arith.addf %57, %56 : vector<8x128xf32>
      %59 = arith.divf %57, %58 : vector<8x128xf32>
      %60 = vector.extract_strided_slice %41 {offsets = [0, 256], sizes = [8, 128], strides = [1, 1]} : vector<8x384xf32> to vector<8x128xf32>
      %61 = vector.extract_strided_slice %43 {offsets = [0, 256], sizes = [8, 128], strides = [1, 1]} : vector<8x384xf32> to vector<8x128xf32>
      %62 = vector.broadcast %8 : vector<1x128xf32> to vector<8x128xf32>
      %63 = arith.addf %61, %62 : vector<8x128xf32>
      %64 = arith.mulf %51, %63 : vector<8x128xf32>
      %65 = arith.addf %60, %64 : vector<8x128xf32>
      %66 = math.tanh %65 : vector<8x128xf32>
      %67 = arith.subf %42, %66 : vector<8x128xf32>
      %68 = arith.mulf %59, %67 : vector<8x128xf32>
      %69 = arith.addf %66, %68 : vector<8x128xf32>
      %c0_54 = arith.constant 0 : index
      %c0_55 = arith.constant 0 : index
      %70 = vector.load %arg15[%c0_54, %c0_55] : memref<8x128xf32, #tpu.memory_space<vmem>>, vector<8x128xf32>
      tpu.vector_store %arg15[%c0_54, %c0_55], %69 {strides = array<i32>} : memref<8x128xf32, #tpu.memory_space<vmem>>, vector<8x128xf32>,
      %71 = arith.index_cast %arg16 : i32 to index
      %c0_56 = arith.constant 0 : index
      %c0_57 = arith.constant 0 : index
      %72 = vector.load %arg14[%71, %c0_56, %c0_57] : memref<8x8x128xf32, #tpu.memory_space<vmem>>, vector<1x8x128xf32>
      %73 = vector.shape_cast %72 : vector<1x8x128xf32> to vector<8x128xf32>
      %74 = vector.shape_cast %69 : vector<8x128xf32> to vector<1x8x128xf32>
      tpu.vector_store %arg14[%71, %c0_56, %c0_57], %74 {strides = array<i32>} : memref<8x8x128xf32, #tpu.memory_space<vmem>>, vector<1x8x128xf32>,
    }
    %c0_22 = arith.constant 0 : index
    %c0_23 = arith.constant 0 : index
    %c0_24 = arith.constant 0 : index
    %20 = vector.load %arg8[%c0_22, %c0_23, %c0_24] : memref<1x128x384xf32, #tpu.memory_space<vmem>>, vector<1x128x384xf32>
    %21 = vector.shape_cast %20 : vector<1x128x384xf32> to vector<128x384xf32>
    %c0_25 = arith.constant 0 : index
    %c0_26 = arith.constant 0 : index
    %c0_27 = arith.constant 0 : index
    %22 = vector.load %arg9[%c0_25, %c0_26, %c0_27] : memref<1x128x384xf32, #tpu.memory_space<vmem>>, vector<1x128x384xf32>
    %23 = vector.shape_cast %22 : vector<1x128x384xf32> to vector<128x384xf32>
    %c0_28 = arith.constant 0 : index
    %c0_29 = arith.constant 0 : index
    %c0_30 = arith.constant 0 : index
    %24 = vector.load %arg10[%c0_28, %c0_29, %c0_30] : memref<1x1x384xf32, #tpu.memory_space<vmem>>, vector<1x1x384xf32>
    %25 = vector.shape_cast %24 : vector<1x1x384xf32> to vector<1x384xf32>
    %c0_31 = arith.constant 0 : index
    %c0_32 = arith.constant 0 : index
    %c0_33 = arith.constant 0 : index
    %26 = vector.load %arg11[%c0_31, %c0_32, %c0_33] : memref<1x1x128xf32, #tpu.memory_space<vmem>>, vector<1x1x128xf32>
    %27 = vector.shape_cast %26 : vector<1x1x128xf32> to vector<1x128xf32>
    %c0_34 = arith.constant 0 : index
    %c0_35 = arith.constant 0 : index
    %c0_36 = arith.constant 0 : index
    %28 = vector.load %arg14[%c0_34, %c0_35, %c0_36] : memref<8x8x128xf32, #tpu.memory_space<vmem>>, vector<8x8x128xf32>
    %29 = vector.shape_cast %28 : vector<8x8x128xf32> to vector<64x128xf32>
    %cst_37 = arith.constant dense<0.000000e+00> : vector<64x384xf32>
    %30 = tpu.matmul %29, %21, %cst_37 {dimension_numbers = #tpu.dot_dimension_numbers<[1], [0], [0], [1], [0, 0, 1, 1], [], []>} : vector<64x128xf32>, vector<128x384xf32>, vector<64x384xf32> -> vector<64x384xf32>
    %31 = vector.broadcast %25 : vector<1x384xf32> to vector<64x384xf32>
    %32 = arith.addf %30, %31 : vector<64x384xf32>
    %33 = vector.shape_cast %32 : vector<64x384xf32> to vector<8x8x384xf32>
    %c0_38 = arith.constant 0 : index
    %c0_39 = arith.constant 0 : index
    %c0_40 = arith.constant 0 : index
    %34 = vector.load %arg13[%c0_38, %c0_39, %c0_40] : memref<8x8x384xf32, #tpu.memory_space<vmem>>, vector<8x8x384xf32>
    tpu.vector_store %arg13[%c0_38, %c0_39, %c0_40], %33 {strides = array<i32>} : memref<8x8x384xf32, #tpu.memory_space<vmem>>, vector<8x8x384xf32>,
    %cst_41 = arith.constant 0.000000e+00 : f32
    %35 = vector.broadcast %cst_41 : f32 to vector<8x128xf32>
    %c0_42 = arith.constant 0 : index
    %c0_43 = arith.constant 0 : index
    %36 = vector.load %arg15[%c0_42, %c0_43] : memref<8x128xf32, #tpu.memory_space<vmem>>, vector<8x128xf32>
    tpu.vector_store %arg15[%c0_42, %c0_43], %35 {strides = array<i32>} : memref<8x128xf32, #tpu.memory_space<vmem>>, vector<8x128xf32>,
    %c0_i32_44 = arith.constant 0 : i32
    %c0_i32_45 = arith.constant 0 : i32
    %37 = arith.subi %2, %c0_i32_45 : i32
    %38 = arith.addi %c0_i32_45, %37 : i32
    %c1_i32_46 = arith.constant 1 : i32
    scf.for %arg16 = %c0_i32_45 to %38 step %c1_i32_46  : i32 {
      %39 = arith.index_cast %arg16 : i32 to index
      %c0_47 = arith.constant 0 : index
      %c0_48 = arith.constant 0 : index
      %40 = vector.load %arg13[%39, %c0_47, %c0_48] : memref<8x8x384xf32, #tpu.memory_space<vmem>>, vector<1x8x384xf32>
      %41 = vector.shape_cast %40 : vector<1x8x384xf32> to vector<8x384xf32>
      %c0_49 = arith.constant 0 : index
      %c0_50 = arith.constant 0 : index
      %42 = vector.load %arg15[%c0_49, %c0_50] : memref<8x128xf32, #tpu.memory_space<vmem>>, vector<8x128xf32>
      %cst_51 = arith.constant dense<0.000000e+00> : vector<8x384xf32>
      %43 = tpu.matmul %42, %23, %cst_51 {dimension_numbers = #tpu.dot_dimension_numbers<[1], [0], [0], [1], [0, 0, 1, 1], [], []>} : vector<8x128xf32>, vector<128x384xf32>, vector<8x384xf32> -> vector<8x384xf32>
      %44 = vector.extract_strided_slice %41 {offsets = [0, 0], sizes = [8, 128], strides = [1, 1]} : vector<8x384xf32> to vector<8x128xf32>
      %45 = vector.extract_strided_slice %43 {offsets = [0, 0], sizes = [8, 128], strides = [1, 1]} : vector<8x384xf32> to vector<8x128xf32>
      %46 = arith.addf %44, %45 : vector<8x128xf32>
      %47 = arith.negf %46 : vector<8x128xf32>
      %48 = math.exp %47 : vector<8x128xf32>
      %cst_52 = arith.constant 1.000000e+00 : f32
      %49 = vector.broadcast %cst_52 : f32 to vector<8x128xf32>
      %50 = arith.addf %49, %48 : vector<8x128xf32>
      %51 = arith.divf %49, %50 : vector<8x128xf32>
      %52 = vector.extract_strided_slice %41 {offsets = [0, 128], sizes = [8, 128], strides = [1, 1]} : vector<8x384xf32> to vector<8x128xf32>
      %53 = vector.extract_strided_slice %43 {offsets = [0, 128], sizes = [8, 128], strides = [1, 1]} : vector<8x384xf32> to vector<8x128xf32>
      %54 = arith.addf %52, %53 : vector<8x128xf32>
      %55 = arith.negf %54 : vector<8x128xf32>
      %56 = math.exp %55 : vector<8x128xf32>
      %cst_53 = arith.constant 1.000000e+00 : f32
      %57 = vector.broadcast %cst_53 : f32 to vector<8x128xf32>
      %58 = arith.addf %57, %56 : vector<8x128xf32>
      %59 = arith.divf %57, %58 : vector<8x128xf32>
      %60 = vector.extract_strided_slice %41 {offsets = [0, 256], sizes = [8, 128], strides = [1, 1]} : vector<8x384xf32> to vector<8x128xf32>
      %61 = vector.extract_strided_slice %43 {offsets = [0, 256], sizes = [8, 128], strides = [1, 1]} : vector<8x384xf32> to vector<8x128xf32>
      %62 = vector.broadcast %27 : vector<1x128xf32> to vector<8x128xf32>
      %63 = arith.addf %61, %62 : vector<8x128xf32>
      %64 = arith.mulf %51, %63 : vector<8x128xf32>
      %65 = arith.addf %60, %64 : vector<8x128xf32>
      %66 = math.tanh %65 : vector<8x128xf32>
      %67 = arith.subf %42, %66 : vector<8x128xf32>
      %68 = arith.mulf %59, %67 : vector<8x128xf32>
      %69 = arith.addf %66, %68 : vector<8x128xf32>
      %c0_54 = arith.constant 0 : index
      %c0_55 = arith.constant 0 : index
      %70 = vector.load %arg15[%c0_54, %c0_55] : memref<8x128xf32, #tpu.memory_space<vmem>>, vector<8x128xf32>
      tpu.vector_store %arg15[%c0_54, %c0_55], %69 {strides = array<i32>} : memref<8x128xf32, #tpu.memory_space<vmem>>, vector<8x128xf32>,
      %c1_i32_56 = arith.constant 1 : i32
      %71 = arith.addi %arg16, %c1_i32_56 : i32
      %72 = vector.broadcast %71 : i32 to vector<8x1xi32>
      %73 = arith.cmpi eq, %0, %72 : vector<8x1xi32>
      %c0_57 = arith.constant 0 : index
      %c0_58 = arith.constant 0 : index
      %74 = vector.load %arg12[%c0_57, %c0_58] : memref<8x128xf32, #tpu.memory_space<vmem>>, vector<8x128xf32>
      %75 = vector.shape_cast %73 : vector<8x1xi1> to vector<8x1xi1>
      %76 = vector.broadcast %75 : vector<8x1xi1> to vector<8x128xi1>
      %77 = arith.select %76, %69, %74 : vector<8x128xi1>, vector<8x128xf32>
      %c0_59 = arith.constant 0 : index
      %c0_60 = arith.constant 0 : index
      %78 = vector.load %arg12[%c0_59, %c0_60] : memref<8x128xf32, #tpu.memory_space<vmem>>, vector<8x128xf32>
      tpu.vector_store %arg12[%c0_59, %c0_60], %77 {strides = array<i32>} : memref<8x128xf32, #tpu.memory_space<vmem>>, vector<8x128xf32>,
    }
    return
  }
  func.func @transform_0(%arg0: i32, %arg1: memref<1xi32, #tpu.memory_space<smem>>) -> (i32, i32, i32) {
    %c0_i32 = arith.constant 0 : i32
    %c0_i32_0 = arith.constant 0 : i32
    %c0_i32_1 = arith.constant 0 : i32
    return %c0_i32, %arg0, %c0_i32_0 : i32, i32, i32
  }
  func.func @transform_1(%arg0: i32, %arg1: memref<1xi32, #tpu.memory_space<smem>>) -> (i32, i32) {
    %c0_i32 = arith.constant 0 : i32
    %c0_i32_0 = arith.constant 0 : i32
    return %arg0, %c0_i32 : i32, i32
  }
  func.func @transform_2(%arg0: i32, %arg1: memref<1xi32, #tpu.memory_space<smem>>) -> (i32, i32) {
    %c0_i32 = arith.constant 0 : i32
    %c0_i32_0 = arith.constant 0 : i32
    %c0_i32_1 = arith.constant 0 : i32
    return %c0_i32, %c0_i32_0 : i32, i32
  }
  func.func @transform_3(%arg0: i32, %arg1: memref<1xi32, #tpu.memory_space<smem>>) -> (i32, i32) {
    %c0_i32 = arith.constant 0 : i32
    %c0_i32_0 = arith.constant 0 : i32
    %c0_i32_1 = arith.constant 0 : i32
    return %c0_i32, %c0_i32_0 : i32, i32
  }
  func.func @transform_4(%arg0: i32, %arg1: memref<1xi32, #tpu.memory_space<smem>>) -> (i32, i32) {
    %c0_i32 = arith.constant 0 : i32
    %c0_i32_0 = arith.constant 0 : i32
    %c0_i32_1 = arith.constant 0 : i32
    return %c0_i32, %c0_i32_0 : i32, i32
  }
  func.func @transform_5(%arg0: i32, %arg1: memref<1xi32, #tpu.memory_space<smem>>) -> (i32, i32) {
    %c0_i32 = arith.constant 0 : i32
    %c0_i32_0 = arith.constant 0 : i32
    %c0_i32_1 = arith.constant 0 : i32
    return %c0_i32, %c0_i32_0 : i32, i32
  }
  func.func @transform_6(%arg0: i32, %arg1: memref<1xi32, #tpu.memory_space<smem>>) -> (i32, i32, i32) {
    %c0_i32 = arith.constant 0 : i32
    %c0_i32_0 = arith.constant 0 : i32
    %c0_i32_1 = arith.constant 0 : i32
    %c0_i32_2 = arith.constant 0 : i32
    return %c0_i32, %c0_i32_0, %c0_i32_1 : i32, i32, i32
  }
  func.func @transform_7(%arg0: i32, %arg1: memref<1xi32, #tpu.memory_space<smem>>) -> (i32, i32, i32) {
    %c0_i32 = arith.constant 0 : i32
    %c0_i32_0 = arith.constant 0 : i32
    %c0_i32_1 = arith.constant 0 : i32
    %c0_i32_2 = arith.constant 0 : i32
    return %c0_i32, %c0_i32_0, %c0_i32_1 : i32, i32, i32
  }
  func.func @transform_8(%arg0: i32, %arg1: memref<1xi32, #tpu.memory_space<smem>>) -> (i32, i32, i32) {
    %c0_i32 = arith.constant 0 : i32
    %c0_i32_0 = arith.constant 0 : i32
    %c0_i32_1 = arith.constant 0 : i32
    %c0_i32_2 = arith.constant 0 : i32
    return %c0_i32, %c0_i32_0, %c0_i32_1 : i32, i32, i32
  }
  func.func @transform_9(%arg0: i32, %arg1: memref<1xi32, #tpu.memory_space<smem>>) -> (i32, i32, i32) {
    %c0_i32 = arith.constant 0 : i32
    %c0_i32_0 = arith.constant 0 : i32
    %c0_i32_1 = arith.constant 0 : i32
    %c0_i32_2 = arith.constant 0 : i32
    return %c0_i32, %c0_i32_0, %c0_i32_1 : i32, i32, i32
  }
  func.func @transform_10(%arg0: i32, %arg1: memref<1xi32, #tpu.memory_space<smem>>) -> (i32, i32) {
    %c0_i32 = arith.constant 0 : i32
    %c0_i32_0 = arith.constant 0 : i32
    return %arg0, %c0_i32 : i32, i32
  }
}

</mosaic_0001>

<bundles_post_ra>
// kernel: func_gru_forward.1
= control target key start
LH: loop header
LB: loop body
LE: loop exit
PB: predicated region body
PF: predicated region fallthrough
CT: control target
= control target key end

     0   :  { %v2062_v3 = vmov 0.0   ;;  %vm117_vm0 = vcmask 261120   ;;  %s2050_s3 = inlined_call_operand.vmem [shape: f32[32,384], index: 3, kind: input, shape index: {}]   ;;  %s2051_s0 = inlined_call_operand.<no memory space> [shape: s32[1], index: 0, kind: input, shape index: {}]   ;;  %s2052_s2 = inlined_call_operand.vmem [shape: s32[8,1], index: 2, kind: input, shape index: {}]   ;;  %s2053_s4 = inlined_call_operand.vmem [shape: f32[128,384], index: 4, kind: input, shape index: {}]   ;;  %s2054_s7 = inlined_call_operand.vmem [shape: f32[1,128,384], index: 7, kind: input, shape index: {}]   ;;  %s2055_s8 = inlined_call_operand.vmem [shape: f32[1,128,384], index: 8, kind: input, shape index: {}]   ;;  %s2056_s9 = inlined_call_operand.vmem [shape: f32[1,1,384], index: 9, kind: input, shape index: {}]   ;;  %s2057_s10 = inlined_call_operand.vmem [shape: f32[1,1,128], index: 10, kind: input, shape index: {}]   ;;  %s2058_s11 = inlined_call_operand.vmem [shape: f32[8,128], index: 11, kind: output, shape index: {}]   ;;  %s2059_s6 = inlined_call_operand.vmem [shape: f32[1,128], index: 6, kind: input, shape index: {}]   ;;  %s2060_s1 = inlined_call_operand.vmem [shape: f32[8,8,32], index: 1, kind: input, shape index: {}]   ;;  %s2061_s5 = inlined_call_operand.vmem [shape: f32[1,384], index: 5, kind: input, shape index: {}]  }
   0x1   :  { %v49_v0 = vld [vmem:[%s2050_s3 + $0x48] sm:$0xff]  ;;  %v1035_v1 = vld [vmem:[%s2050_s3 + $0x58] sm:$0xff]  ;;  %v46_v2 = vld [vmem:[%s2050_s3 + $0x30] sm:$0xff]  ;;  %39 = vst [vmem:[%s2058_s11] sm:$0xff] %v2062_v3  ;;  %p857_p0 = scmp.le.s32.totalorder %s2051_s0, 0 }
   0x2   :  { %868 = vmatpush.msra.mxu3 %v49_v0  ;;  %236 = vmatpush.msra.mxu2 %v1035_v1  ;;  %v1048_v4 = vld [vmem:[%s2050_s3 + $0x40] sm:$0xff]  ;;  %v43_v5 = vld [vmem:[%s2050_s3 + $0x18] sm:$0xff]  ;;  %v1056_v6 = vld [vmem:[%s2050_s3 + $0x28] sm:$0xff]  ;;  %289 = vst [vmem:[#allocation4] sm:$0xff] %v2062_v3  ;;  %s1420_s19 = smov (!%p857_p0), 0  }
   0x3   :  { %v1062_v7 = vld [vmem:[%s2052_s2] sm:$0xff]  ;;  %v1072_v9 = vld [vmem:[%s2053_s4 + $0x8] sm:$0xff]  ;;  %154 = vmatpush.msra.mxu0 %v49_v0  ;;  %v1078_v10 = vld [vmem:[%s2053_s4 + $0x10] sm:$0xff] }
   0x4   :  { %2063 = vst [vmem:[#allocation7_spill] sm:$0xff] %v1062_v7  ;;  %v1067_v8 = vld [vmem:[%s2053_s4] sm:$0xff]  ;;  %869 = vmatpush.msra.mxu3 %v46_v2  ;;  %237 = vmatpush.msra.mxu2 %v1048_v4  ;;  %v1083_v11 = vld [vmem:[%s2053_s4 + $0x18] sm:$0xff]  ;;  %v1093_v13 = vld [vmem:[%s2053_s4 + $0x28] sm:$0xff] }
   0x5   :  { %2064 = vst [vmem:[#allocation8_spill] sm:$0xff] %v1067_v8  ;;  %v1088_v12 = vld [vmem:[%s2053_s4 + $0x20] sm:$0xff]  ;;  %v1098_v14 = vld [vmem:[%s2053_s4 + $0x30] sm:$0xff]  ;;  %v1103_v15 = vld [vmem:[%s2053_s4 + $0x38] sm:$0xff]  ;;  %155 = vmatpush.msra.mxu0 %v46_v2 }
   0x6   :  { %2065 = vst [vmem:[#allocation9_spill] sm:$0xff] %v1072_v9  ;;  %870 = vmatpush.msra.mxu3 %v43_v5  ;;  %238 = vmatpush.msra.mxu2 %v1056_v6  ;;  %v1109_v16 = vld [vmem:[%s2053_s4 + $0x40] sm:$0xff]  ;;  %v1114_v17 = vld [vmem:[%s2053_s4 + $0x48] sm:$0xff]  ;;  %v1119_v18 = vld [vmem:[%s2053_s4 + $0x50] sm:$0xff] }
   0x7   :  { %2066 = vst [vmem:[#allocation10_spill] sm:$0xff] %v1078_v10  ;;  %v1124_v19 = vld [vmem:[%s2053_s4 + $0x58] sm:$0xff]  ;;  %v1129_v20 = vld [vmem:[%s2053_s4 + $0x60] sm:$0xff]  ;;  %v1134_v21 = vld [vmem:[%s2053_s4 + $0x68] sm:$0xff]  ;;  %156 = vmatpush.msra.mxu0 %v43_v5 }
   0x8   :  { %2067 = vst [vmem:[#allocation11_spill] sm:$0xff] %v1083_v11  ;;  %v1139_v22 = vld [vmem:[%s2053_s4 + $0x70] sm:$0xff]  ;;  %v1144_v23 = vld [vmem:[%s2053_s4 + $0x78] sm:$0xff]  ;;  %v1149_v24 = vld [vmem:[%s2053_s4 + $0x80] sm:$0xff] }
   0x9   :  { %2068 = vst [vmem:[#allocation12_spill] sm:$0xff] %v1088_v12  ;;  %v1154_v25 = vld [vmem:[%s2053_s4 + $0x88] sm:$0xff]  ;;  %v1159_v26 = vld [vmem:[%s2053_s4 + $0x90] sm:$0xff]  ;;  %v1164_v27 = vld [vmem:[%s2053_s4 + $0x98] sm:$0xff] }
   0xa   :  { %2069 = vst [vmem:[#allocation13_spill] sm:$0xff] %v1093_v13  ;;  %v1169_v28 = vld [vmem:[%s2053_s4 + $0xa0] sm:$0xff]  ;;  %v1174_v29 = vld [vmem:[%s2053_s4 + $0xa8] sm:$0xff]  ;;  %v1179_v30 = vld [vmem:[%s2053_s4 + $0xb0] sm:$0xff] }
   0xb   :  { %2070 = vst [vmem:[#allocation14_spill] sm:$0xff] %v1098_v14  ;;  %v1184_v31 = vld [vmem:[%s2053_s4 + $0xb8] sm:$0xff]  ;;  %v1189_v32 = vld [vmem:[%s2053_s4 + $0xc0] sm:$0xff]  ;;  %v1194_v33 = vld [vmem:[%s2053_s4 + $0xc8] sm:$0xff] }
   0xc   :  { %2071 = vst [vmem:[#allocation15_spill] sm:$0xff] %v1103_v15  ;;  %v1199_v34 = vld [vmem:[%s2053_s4 + $0xd0] sm:$0xff]  ;;  %v1204_v35 = vld [vmem:[%s2053_s4 + $0xd8] sm:$0xff]  ;;  %v1209_v36 = vld [vmem:[%s2053_s4 + $0xe0] sm:$0xff] }
   0xd   :  { %v1214_v37 = vld [vmem:[%s2053_s4 + $0xe8] sm:$0xff]  ;;  %v1219_v38 = vld [vmem:[%s2053_s4 + $0xf0] sm:$0xff]  ;;  %v1224_v39 = vld [vmem:[%s2053_s4 + $0xf8] sm:$0xff] }
   0xe   :  { %v1229_v40 = vld [vmem:[%s2053_s4 + $0x100] sm:$0xff]  ;;  %v1234_v41 = vld [vmem:[%s2053_s4 + $0x108] sm:$0xff]  ;;  %v1239_v42 = vld [vmem:[%s2053_s4 + $0x110] sm:$0xff] }
   0xf   :  { %v1244_v43 = vld [vmem:[%s2053_s4 + $0x118] sm:$0xff]  ;;  %v1249_v44 = vld [vmem:[%s2053_s4 + $0x120] sm:$0xff]  ;;  %v1254_v45 = vld [vmem:[%s2053_s4 + $0x128] sm:$0xff] }
  0x10   :  { %v1259_v46 = vld [vmem:[%s2053_s4 + $0x130] sm:$0xff]  ;;  %v1264_v47 = vld [vmem:[%s2053_s4 + $0x138] sm:$0xff]  ;;  %v1269_v48 = vld [vmem:[%s2053_s4 + $0x140] sm:$0xff] }
  0x11   :  { %v1274_v49 = vld [vmem:[%s2053_s4 + $0x148] sm:$0xff]  ;;  %v1279_v50 = vld [vmem:[%s2053_s4 + $0x150] sm:$0xff]  ;;  %v1284_v51 = vld [vmem:[%s2053_s4 + $0x158] sm:$0xff] }
  0x12   :  { %v1289_v52 = vld [vmem:[%s2053_s4 + $0x160] sm:$0xff]  ;;  %v1294_v53 = vld [vmem:[%s2053_s4 + $0x168] sm:$0xff]  ;;  %v1299_v54 = vld [vmem:[%s2053_s4 + $0x170] sm:$0xff] }
  0x13   :  { %v1304_v55 = vld [vmem:[%s2053_s4 + $0x178] sm:$0xff]  ;;  %v1309_v56 = vld [vmem:[%s2059_s6] sm:$0x1]  ;;  %v50_v58 = vld [vmem:[%s2050_s3 + $0x50] sm:$0xff] }
  0x14   :  { %2072 = vst [vmem:[#allocation16_spill] sm:$0xff] %v1309_v56  ;;  %v40_v57 = vld [vmem:[%s2050_s3] sm:$0xff]  ;;  %v42_v59 = vld [vmem:[%s2050_s3 + $0x10] sm:$0xff]  ;;  %195 = vmatpush.msra.mxu1 %v50_v58  ;;  %v47_v62 = vld [vmem:[%s2050_s3 + $0x38] sm:$0xff] }
  0x15   :  { %871 = vmatpush.msra.mxu3 %v40_v57  ;;  %v108_v60 = vld [vmem:[%s2060_s1 + $0x30] sm:$0xff]  ;;  %157 = vmatpush.msra.mxu0 %v40_v57  ;;  %v102_v61 = vld [vmem:[%s2060_s1] sm:$0xff]  ;;  %v41_v0 = vld [vmem:[%s2050_s3 + $0x8] sm:$0xff] }
  0x16   :  { %239 = vmatpush.msra.mxu2 %v42_v59  ;;  %839 = vmatmul.msk.f32.vlgmr.msra.gmra.mxu3 %vm117_vm0, %v108_v60  ;;  %v44_v63 = vld [vmem:[%s2050_s3 + $0x20] sm:$0xff]  ;;  %v109_v2 = vld [vmem:[%s2060_s1 + $0x38] sm:$0xff]  ;;  %v103_v5 = vld [vmem:[%s2060_s1 + $0x8] sm:$0xff] }
  0x17   :  { %849 = vmatmul.msk.f32.vlgmr.msra.gmra.mxu2 %vm117_vm0, %v102_v61  ;;  %872 = vmatpush.msrb.mxu3 %v50_v58  ;;  %v104_v57 = vld [vmem:[%s2060_s1 + $0x10] sm:$0xff]  ;;  %v100_v58 = vld [vmem:[%s2061_s5] sm:$0x7] }
  0x18   :  { %196 = vmatpush.msra.mxu1 %v47_v62  ;;  %833 = vmatmul.msk.f32.vlgmr.msra.gmra.mxu0 %vm117_vm0, %v102_v61 }
  0x19   :  { %873 = vmatpush.msrb.mxu3 %v47_v62  ;;  %v1386_v62 = vperm.slane %v100_v58, 1 }
  0x1a   :  { %197 = vmatpush.msra.mxu1 %v44_v63 }
  0x1b   :  { %874 = vmatpush.msrb.mxu3 %v44_v63  ;;  %v1388_v63 = vperm.slane %v100_v58, 2 }
  0x1c   :  { %198 = vmatpush.msra.mxu1 %v41_v0 }
  0x1d   :  { %841 = vmatmul.msk.f32.vlgmr.msra.gmra.mxu1 %vm117_vm0, %v102_v61  ;;  %875 = vmatpush.msrb.mxu3 %v41_v0 }
  0x1e   :  { %840 = vmatmul.msk.f32.gmra.mxu3 %vm117_vm0, %v109_v2 }
  0x1f   :  { %850 = vmatmul.msk.f32.gmra.mxu2 %vm117_vm0, %v103_v5  ;;  %876 = vmatpush.msra.mxu3 %v1035_v1  ;;  %v105_v1 = vld [vmem:[%s2060_s1 + $0x18] sm:$0xff] }
  0x20   :  { %834 = vmatmul.msk.f32.gmra.mxu0 %vm117_vm0, %v103_v5 }
  0x21   :  { %877 = vmatpush.msra.mxu3 %v1048_v4  ;;  %v106_v4 = vld [vmem:[%s2060_s1 + $0x20] sm:$0xff] }
  0x23   :  { %878 = vmatpush.msra.mxu3 %v1056_v6  ;;  %v107_v6 = vld [vmem:[%s2060_s1 + $0x28] sm:$0xff] }
  0x25   :  { %842 = vmatmul.msk.f32.gmra.mxu1 %vm117_vm0, %v103_v5  ;;  %879 = vmatpush.msra.mxu3 %v42_v59  ;;  %v1383_v59 = vperm.slane %v100_v58, 0 }
  0x26   :  { %847 = vmatmul.msk.f32.vlgmr.msrb.gmra.mxu3 %vm117_vm0, %v108_v60 }
  0x27   :  { %851 = vmatmul.msk.f32.gmra.mxu2 %vm117_vm0, %v104_v57 }
  0x28   :  { %835 = vmatmul.msk.f32.gmra.mxu0 %vm117_vm0, %v104_v57 }
  0x2d   :  { %843 = vmatmul.msk.f32.gmra.mxu1 %vm117_vm0, %v104_v57 }
  0x2e   :  { %848 = vmatmul.msk.f32.gmra.mxu3 %vm117_vm0, %v109_v2 }
  0x2f   :  { %852 = vmatmul.msk.f32.gmra.mxu2 %vm117_vm0, %v105_v1 }
  0x30   :  { %836 = vmatmul.msk.f32.gmra.mxu0 %vm117_vm0, %v105_v1 }
  0x35   :  { %844 = vmatmul.msk.f32.gmra.mxu1 %vm117_vm0, %v105_v1 }
  0x36   :  { %855 = vmatmul.msk.f32.vlgmr.msra.gmra.mxu3 %vm117_vm0, %v108_v60 }
  0x37   :  { %853 = vmatmul.msk.f32.gmra.mxu2 %vm117_vm0, %v106_v4 }
  0x38   :  { %837 = vmatmul.msk.f32.gmra.mxu0 %vm117_vm0, %v106_v4 }
  0x3d   :  { %845 = vmatmul.msk.f32.gmra.mxu1 %vm117_vm0, %v106_v4 }
  0x3e   :  { %856 = vmatmul.msk.f32.gmra.mxu3 %vm117_vm0, %v109_v2 }
  0x3f   :  { %854 = vmatmul.msk.f32.gmra.mxu2 %vm117_vm0, %v107_v6 }
  0x40   :  { %838 = vmatmul.msk.f32.gmra.mxu0 %vm117_vm0, %v107_v6 }
  0x45   :  { %846 = vmatmul.msk.f32.gmra.mxu1 %vm117_vm0, %v107_v6 }
  0x95   :  { %v159_v60 = vpop.f32.mrf.mxu0 }
  0x96   :  { %v160_v61 = vadd.f32 %v159_v60, %v1383_v59 }
  0x98   :  { %265 = vst [vmem:[#allocation2] sm:$0xff] %v160_v61 }
  0x99   :  { %v177_v0 = vpop.f32.mrf.mxu3 }
  0x9a   :  { %v200_v2 = vpop.f32.mrf.mxu1  ;;  %v178_v5 = vadd.f32 %v177_v0, %v1383_v59  ;;  %v241_v1 = vpop.f32.mrf.mxu2 }
  0x9b   :  { %v201_v57 = vadd.f32 %v200_v2, %v1386_v62  ;;  %v242_v4 = vadd.f32 %v241_v1, %v1388_v63 }
  0x9c   :  { %283 = vst [vmem:[#allocation2 + $0x90] sm:$0xff] %v178_v5 }
  0x9d   :  { %266 = vst [vmem:[#allocation2 + $0x8] sm:$0xff] %v201_v57  ;;  %v162_v6 = vpop.f32.mrf.mxu0 }
  0x9e   :  { %267 = vst [vmem:[#allocation2 + $0x10] sm:$0xff] %v242_v4  ;;  %v163_v60 = vadd.f32 %v162_v6, %v1383_v59 }
  0xa0   :  { %268 = vst [vmem:[#allocation2 + $0x18] sm:$0xff] %v163_v60 }
  0xa1   :  { %v180_v3 = vpop.f32.mrf.mxu3 }
  0xa2   :  { %v203_v58 = vpop.f32.mrf.mxu1  ;;  %v181_v61 = vadd.f32 %v180_v3, %v1383_v59  ;;  %v244_v56 = vpop.f32.mrf.mxu2 }
  0xa3   :  { %v204_v7 = vadd.f32 %v203_v58, %v1386_v62  ;;  %v245_v0 = vadd.f32 %v244_v56, %v1388_v63 }
  0xa4   :  { %286 = vst [vmem:[#allocation2 + $0xa8] sm:$0xff] %v181_v61 }
  0xa5   :  { %269 = vst [vmem:[#allocation2 + $0x20] sm:$0xff] %v204_v7  ;;  %v165_v2 = vpop.f32.mrf.mxu0 }
  0xa6   :  { %270 = vst [vmem:[#allocation2 + $0x28] sm:$0xff] %v245_v0  ;;  %v166_v5 = vadd.f32 %v165_v2, %v1383_v59 }
  0xa8   :  { %271 = vst [vmem:[#allocation2 + $0x30] sm:$0xff] %v166_v5 }
  0xa9   :  { %v218_v1 = vpop.f32.mrf.mxu3 }
  0xaa   :  { %v206_v57 = vpop.f32.mrf.mxu1  ;;  %v219_v6 = vadd.f32 %v218_v1, %v1386_v62  ;;  %v247_v60 = vpop.f32.mrf.mxu2 }
  0xab   :  { %v207_v4 = vadd.f32 %v206_v57, %v1386_v62  ;;  %v248_v3 = vadd.f32 %v247_v60, %v1388_v63 }
  0xac   :  { %284 = vst [vmem:[#allocation2 + $0x98] sm:$0xff] %v219_v6 }
  0xad   :  { %272 = vst [vmem:[#allocation2 + $0x38] sm:$0xff] %v207_v4  ;;  %v168_v58 = vpop.f32.mrf.mxu0 }
  0xae   :  { %273 = vst [vmem:[#allocation2 + $0x40] sm:$0xff] %v248_v3  ;;  %v169_v7 = vadd.f32 %v168_v58, %v1383_v59 }
  0xb0   :  { %274 = vst [vmem:[#allocation2 + $0x48] sm:$0xff] %v169_v7 }
  0xb1   :  { %v221_v61 = vpop.f32.mrf.mxu3 }
  0xb2   :  { %v209_v56 = vpop.f32.mrf.mxu1  ;;  %v222_v2 = vadd.f32 %v221_v61, %v1386_v62  ;;  %v250_v5 = vpop.f32.mrf.mxu2 }
  0xb3   :  { %v210_v0 = vadd.f32 %v209_v56, %v1386_v62  ;;  %v251_v57 = vadd.f32 %v250_v5, %v1388_v63 }
  0xb4   :  { %287 = vst [vmem:[#allocation2 + $0xb0] sm:$0xff] %v222_v2 }
  0xb5   :  { %275 = vst [vmem:[#allocation2 + $0x50] sm:$0xff] %v210_v0  ;;  %v171_v1 = vpop.f32.mrf.mxu0 }
  0xb6   :  { %276 = vst [vmem:[#allocation2 + $0x58] sm:$0xff] %v251_v57  ;;  %v172_v4 = vadd.f32 %v171_v1, %v1383_v59 }
  0xb8   :  { %277 = vst [vmem:[#allocation2 + $0x60] sm:$0xff] %v172_v4 }
  0xb9   :  { %v259_v60 = vpop.f32.mrf.mxu3 }
  0xba   :  { %v212_v6 = vpop.f32.mrf.mxu1  ;;  %v253_v58 = vpop.f32.mrf.mxu2  ;;  %v260_v7 = vadd.f32 %v259_v60, %v1388_v63 }
  0xbb   :  { %v213_v3 = vadd.f32 %v212_v6, %v1386_v62  ;;  %v254_v56 = vadd.f32 %v253_v58, %v1388_v63 }
  0xbc   :  { %285 = vst [vmem:[#allocation2 + $0xa0] sm:$0xff] %v260_v7 }
  0xbd   :  { %278 = vst [vmem:[#allocation2 + $0x68] sm:$0xff] %v213_v3  ;;  %v174_v61 = vpop.f32.mrf.mxu0 }
  0xbe   :  { %279 = vst [vmem:[#allocation2 + $0x70] sm:$0xff] %v254_v56  ;;  %v175_v0 = vadd.f32 %v174_v61, %v1383_v59 }
  0xc0   :  { %280 = vst [vmem:[#allocation2 + $0x78] sm:$0xff] %v175_v0 }
  0xc1   :  { %v262_v5 = vpop.f32.mrf.mxu3 }
  0xc2   :  { %v215_v2 = vpop.f32.mrf.mxu1  ;;  %v256_v1 = vpop.f32.mrf.mxu2  ;;  %v263_v4 = vadd.f32 %v262_v5, %v1388_v63  ;;  %825 = sbr.rel (%p857_p0) target bundleno = 405 (0x195), region = 71 }
  0xc3   :  { %v216_v57 = vadd.f32 %v215_v2, %v1386_v62  ;;  %v257_v6 = vadd.f32 %v256_v1, %v1388_v63 }
  0xc4   :  { %288 = vst [vmem:[#allocation2 + $0xb8] sm:$0xff] %v263_v4 }
  0xc5   :  { %281 = vst [vmem:[#allocation2 + $0x80] sm:$0xff] %v216_v57 }
  0xc6   :  { %282 = vst [vmem:[#allocation2 + $0x88] sm:$0xff] %v257_v6 }
  0xc7 LB: > { %303 = vmatpush.msra.mxu0 %v1294_v53  ;;  %323 = vmatpush.msra.mxu1 %v1299_v54  ;;  %v2073_v14 = vld [vmem:[#allocation14_spill] sm:$0xff]  ;;  %v2074_v15 = vld [vmem:[#allocation15_spill] sm:$0xff]  ;;  %v2076_v12 = vld [vmem:[#allocation12_spill] sm:$0xff]  ;;  %s866_s2 = smul.u32 24, %s961_s19  ;;  %s861_s21 = sshll.u32 %s961_s19, 3  ;;  %s961_s19 = sphi %s1420_s19, %s293_s19  }
  0xc8   : > { %343 = vmatpush.msra.mxu2 %v1304_v55  ;;  %v2075_v11 = vld [vmem:[#allocation11_spill] sm:$0xff]  ;;  %v1469_v59 = vld [vmem:[#allocation4] sm:$0xff]  ;;  %v2077_v13 = vld [vmem:[#allocation13_spill] sm:$0xff]  ;;  %s415_s22 = scalar_lea.vmem [#allocation3], %s861_s21  ;;  %s293_s19 = sadd.s32 1, %s961_s19  }
  0xc9   : > { %304 = vmatpush.msra.mxu0 %v1279_v50  ;;  %324 = vmatpush.msra.mxu1 %v1284_v51  ;;  %v2078_v8 = vld [vmem:[#allocation8_spill] sm:$0xff]  ;;  %v2079_v9 = vld [vmem:[#allocation9_spill] sm:$0xff]  ;;  %v2080_v10 = vld [vmem:[#allocation10_spill] sm:$0xff]  ;;  %s1479_s20 = scalar_lea.vmem [#allocation2], %s866_s2  ;;  %p292_p1 = scmp.ge.s32.totalorder %s293_s19, %s2051_s0 }
  0xca   : > { %344 = vmatpush.msra.mxu2 %v1289_v52 }
  0xcb   : > { %305 = vmatpush.msra.mxu0 %v1264_v47  ;;  %325 = vmatpush.msra.mxu1 %v1269_v48 }
  0xcc   : > { %345 = vmatpush.msra.mxu2 %v1274_v49 }
  0xcd   : > { %306 = vmatpush.msra.mxu0 %v1249_v44  ;;  %326 = vmatpush.msra.mxu1 %v1254_v45  ;;  %v299_v62 = vld [vmem:[%s1479_s20] sm:$0xff]  ;;  %v300_v63 = vld [vmem:[%s1479_s20 + $0x8] sm:$0xff] }
  0xce   : > { %346 = vmatpush.msra.mxu2 %v1259_v46 }
  0xcf   : > { %307 = vmatpush.msra.mxu0 %v1234_v41  ;;  %327 = vmatpush.msra.mxu1 %v1239_v42 }
  0xd0   : > { %347 = vmatpush.msra.mxu2 %v1244_v43 }
  0xd1   : > { %308 = vmatpush.msra.mxu0 %v1219_v38  ;;  %328 = vmatpush.msra.mxu1 %v1224_v39 }
  0xd2   : > { %348 = vmatpush.msra.mxu2 %v1229_v40 }
  0xd3   : > { %309 = vmatpush.msra.mxu0 %v1204_v35  ;;  %329 = vmatpush.msra.mxu1 %v1209_v36 }
  0xd4   : > { %349 = vmatpush.msra.mxu2 %v1214_v37 }
  0xd5   : > { %310 = vmatpush.msra.mxu0 %v1189_v32  ;;  %330 = vmatpush.msra.mxu1 %v1194_v33 }
  0xd6   : > { %350 = vmatpush.msra.mxu2 %v1199_v34 }
  0xd7   : > { %311 = vmatpush.msra.mxu0 %v1174_v29  ;;  %331 = vmatpush.msra.mxu1 %v1179_v30 }
  0xd8   : > { %351 = vmatpush.msra.mxu2 %v1184_v31 }
  0xd9   : > { %312 = vmatpush.msra.mxu0 %v1159_v26  ;;  %332 = vmatpush.msra.mxu1 %v1164_v27 }
  0xda   : > { %352 = vmatpush.msra.mxu2 %v1169_v28 }
  0xdb   : > { %313 = vmatpush.msra.mxu0 %v1144_v23  ;;  %333 = vmatpush.msra.mxu1 %v1149_v24 }
  0xdc   : > { %353 = vmatpush.msra.mxu2 %v1154_v25 }
  0xdd   : > { %314 = vmatpush.msra.mxu0 %v1129_v20  ;;  %334 = vmatpush.msra.mxu1 %v1134_v21 }
  0xde   : > { %354 = vmatpush.msra.mxu2 %v1139_v22 }
  0xdf   : > { %315 = vmatpush.msra.mxu0 %v1114_v17  ;;  %335 = vmatpush.msra.mxu1 %v1119_v18 }
  0xe0   : > { %355 = vmatpush.msra.mxu2 %v1124_v19 }
  0xe1   : > { %316 = vmatpush.msra.mxu0 %v2073_v14  ;;  %336 = vmatpush.msra.mxu1 %v2074_v15 }
  0xe2   : > { %356 = vmatpush.msra.mxu2 %v1109_v16 }
  0xe3   : > { %317 = vmatpush.msra.mxu0 %v2075_v11  ;;  %337 = vmatpush.msra.mxu1 %v2076_v12 }
  0xe4   : > { %357 = vmatpush.msra.mxu2 %v2077_v13 }
  0xe5   : > { %318 = vmatpush.msra.mxu0 %v2078_v8  ;;  %338 = vmatpush.msra.mxu1 %v2079_v9  ;;  %v2081_v9 = vld [vmem:[#allocation16_spill] sm:$0xff] }
  0xe6   : > { %319 = vmatmul.f32.vlgmr.msra.gmra.mxu0 %v1469_v59  ;;  %339 = vmatmul.f32.vlgmr.msra.gmra.mxu1 %v1469_v59 }
  0xe7   : > { %358 = vmatpush.msra.mxu2 %v2080_v10  ;;  %v404_v10 = vperm.slane %v2081_v9, 0 }
  0xe8   : > { %359 = vmatmul.f32.vlgmr.msra.gmra.mxu2 %v1469_v59 }
 0x163   : > { %v320_v60 = vpop.f32.mrf.mxu0  ;;  %v340_v3 = vpop.f32.mrf.mxu1 }
 0x164   : > { %v363_v58 = vadd.f32 %v320_v60, %v299_v62  ;;  %v383_v7 = vadd.f32 %v340_v3, %v300_v63 }
 0x166   : > { %v859_v56 = vmul.f32 -1.442695, %v363_v58  ;;  %v860_v61 = vmul.f32 -1.442695, %v383_v7 }
 0x168   : > { %930 = vpow2.f32 %v859_v56 }
 0x169   : > { %932 = vpow2.f32 %v860_v61 }
 0x16b   : > { %v360_v62 = vpop.f32.mrf.mxu2 }
 0x16c   : > { %v406_v7 = vadd.f32 %v404_v10, %v360_v62 }
 0x16e   : > { %v931_v0 = vpop.eup %930 }
 0x16f   : > { %v933_v2 = vpop.eup %932  ;;  %v367_v5 = vadd.f32 1.0, %v931_v0 }
 0x170   : > { %v387_v57 = vadd.f32 1.0, %v933_v2  ;;  %v301_v2 = vld [vmem:[%s1479_s20 + $0x10] sm:$0xff] }
 0x171   : > { %934 = vrcp.f32 %v367_v5  ;;  %v379_v63 = vand.u32 2147483648, %v367_v5  ;;  %v377_v3 = vand.u32 2147483647, %v367_v5  ;;  %vm373_vm2 = vweird.f32 %v367_v5 }
 0x172   : > { %936 = vrcp.f32 %v387_v57  ;;  %vm393_vm5 = vweird.f32 %v387_v57  ;;  %v399_v14 = vand.u32 2147483648, %v387_v57  ;;  %v397_v15 = vand.u32 2147483647, %v387_v57 }
 0x173   : > { %v380_v61 = vor.u32 1.1754944e-38, %v379_v63  ;;  %vm378_vm4 = vcmp.eq.f32.partialorder %v377_v3, 8.507059e+37 }
 0x174   : > { %vm398_vm8 = vcmp.eq.f32.partialorder %v397_v15, 8.507059e+37 }
 0x177   : > { %v935_v1 = vpop.eup %934 }
 0x178   : > { %v937_v4 = vpop.eup %936  ;;  %v369_v6 = vmul.f32 %v935_v1, %v367_v5  ;;  %vm374_vm1 = vweird.f32 %v935_v1  ;;  %v400_v5 = vor.u32 1.1754944e-38, %v399_v14 }
 0x179   : > { %v389_v11 = vmul.f32 %v937_v4, %v387_v57  ;;  %vm375_vm3 = vmor %vm373_vm2, %vm374_vm1  ;;  %vm394_vm6 = vweird.f32 %v937_v4 }
 0x17a   : > { %v370_v8 = vsub.f32 1.0, %v369_v6  ;;  %vm395_vm7 = vmor %vm393_vm5, %vm394_vm6 }
 0x17b   : > { %v390_v56 = vsub.f32 1.0, %v389_v11 }
 0x17c   : > { %v371_v60 = vmul.f32 %v935_v1, %v370_v8 }
 0x17d   : > { %v391_v13 = vmul.f32 %v937_v4, %v390_v56 }
 0x17e   : > { %v372_v58 = vadd.f32 %v935_v1, %v371_v60 }
 0x17f   : > { %v392_v8 = vadd.f32 %v937_v4, %v391_v13 }
 0x180   : > { %v376_v0 = vsel %vm375_vm3, %v935_v1, %v372_v58 }
 0x181   : > { %v381_v12 = vsel %vm378_vm4, %v380_v61, %v376_v0  ;;  %v396_v10 = vsel %vm395_vm7, %v937_v4, %v392_v8 }
 0x182   : > { %v407_v6 = vmul.f32 %v406_v7, %v381_v12  ;;  %v401_v62 = vsel %vm398_vm8, %v400_v5, %v396_v10 }
 0x184   : > { %v408_v9 = vadd.f32 %v407_v6, %v301_v2 }
 0x186   : > { %938 = vtanh.f32 %v408_v9 }
 0x18c   : > { %v939_v11 = vpop.eup %938 }
 0x18d   : > { %v410_v1 = vsub.f32 %v1469_v59, %v939_v11 }
 0x18f   : > { %v411_v63 = vmul.f32 %v410_v1, %v401_v62 }
 0x190   :  { %295 = sbr.rel (!%p292_p1) target bundleno = 199 (0xc7), region = 77 }
 0x191   : > { %v412_v60 = vadd.f32 %v939_v11, %v411_v63 }
 0x193   : > { %413 = vst [vmem:[#allocation4] sm:$0xff] %v412_v60 }
 0x194   : > { %416 = vst [vmem:[%s415_s22] sm:$0xff] %v412_v60 }
 0x195 PF:  { %v464_v12 = vld [vmem:[%s2054_s7 + $0x178] sm:$0xff]  ;;  %v461_v13 = vld [vmem:[%s2054_s7 + $0x160] sm:$0xff]  ;;  %v2082_v14 = vmov 0.0   ;;  %v458_v15 = vld [vmem:[%s2054_s7 + $0x148] sm:$0xff]  ;;  %s1966_s5 = smov (!%p857_p0), 0  }
 0x196   :  { %677 = vst [vmem:[#allocation4] sm:$0xff] %v2082_v14  ;;  %612 = vmatpush.msra.mxu2 %v464_v12  ;;  %v1506_v59 = vld [vmem:[%s2054_s7 + $0x170] sm:$0xff]  ;;  %v1515_v17 = vld [vmem:[%s2054_s7 + $0x158] sm:$0xff]  ;;  %v1523_v19 = vld [vmem:[%s2054_s7 + $0x140] sm:$0xff] }
 0x197   :  { %v455_v16 = vld [vmem:[%s2054_s7 + $0x130] sm:$0xff]  ;;  %571 = vmatpush.msra.mxu1 %v1506_v59  ;;  %v452_v18 = vld [vmem:[%s2054_s7 + $0x118] sm:$0xff]  ;;  %v1528_v20 = vld [vmem:[%s2054_s7 + $0x128] sm:$0xff] }
 0x198   :  { %613 = vmatpush.msra.mxu2 %v461_v13  ;;  %v462_v21 = vld [vmem:[%s2054_s7 + $0x168] sm:$0xff]  ;;  %v1537_v22 = vld [vmem:[%s2055_s8] sm:$0xff]  ;;  %v1550_v25 = vld [vmem:[%s2055_s8 + $0x10] sm:$0xff] }
 0x199   :  { %572 = vmatpush.msra.mxu1 %v1515_v17  ;;  %2083 = vst [vmem:[#allocation8_spill] sm:$0xff] %v1537_v22  ;;  %v1542_v23 = vld [vmem:[%s2055_s8 + $0x8] sm:$0xff]  ;;  %v449_v24 = vld [vmem:[%s2054_s7 + $0x100] sm:$0xff]  ;;  %v1555_v26 = vld [vmem:[%s2055_s8 + $0x18] sm:$0xff]  ;;  %530 = vmatpush.msra.mxu0 %v462_v21 }
 0x19a   :  { %614 = vmatpush.msra.mxu2 %v458_v15  ;;  %2084 = vst [vmem:[#allocation9_spill] sm:$0xff] %v1542_v23  ;;  %v1560_v27 = vld [vmem:[%s2055_s8 + $0x20] sm:$0xff]  ;;  %880 = vmatpush.msra.mxu3 %v462_v21  ;;  %v1566_v28 = vld [vmem:[%s2055_s8 + $0x28] sm:$0xff]  ;;  %v1571_v29 = vld [vmem:[%s2055_s8 + $0x30] sm:$0xff] }
 0x19b   :  { %2085 = vst [vmem:[#allocation10_spill] sm:$0xff] %v1550_v25  ;;  %573 = vmatpush.msra.mxu1 %v1523_v19  ;;  %v1576_v30 = vld [vmem:[%s2055_s8 + $0x38] sm:$0xff]  ;;  %v446_v31 = vld [vmem:[%s2054_s7 + $0xe8] sm:$0xff]  ;;  %v1584_v32 = vld [vmem:[%s2055_s8 + $0x40] sm:$0xff] }
 0x19c   :  { %2086 = vst [vmem:[#allocation11_spill] sm:$0xff] %v1555_v26  ;;  %615 = vmatpush.msra.mxu2 %v455_v16  ;;  %v1589_v33 = vld [vmem:[%s2055_s8 + $0x48] sm:$0xff]  ;;  %v1594_v34 = vld [vmem:[%s2055_s8 + $0x50] sm:$0xff]  ;;  %v1600_v35 = vld [vmem:[%s2055_s8 + $0x58] sm:$0xff] }
 0x19d   :  { %2087 = vst [vmem:[#allocation12_spill] sm:$0xff] %v1560_v27  ;;  %574 = vmatpush.msra.mxu1 %v1528_v20  ;;  %v1605_v36 = vld [vmem:[%s2055_s8 + $0x60] sm:$0xff]  ;;  %v1610_v37 = vld [vmem:[%s2055_s8 + $0x68] sm:$0xff]  ;;  %v443_v38 = vld [vmem:[%s2054_s7 + $0xd0] sm:$0xff] }
 0x19e   :  { %2088 = vst [vmem:[#allocation13_spill] sm:$0xff] %v1566_v28  ;;  %616 = vmatpush.msra.mxu2 %v452_v18  ;;  %v1618_v39 = vld [vmem:[%s2055_s8 + $0x70] sm:$0xff]  ;;  %v1623_v40 = vld [vmem:[%s2055_s8 + $0x78] sm:$0xff]  ;;  %v1628_v41 = vld [vmem:[%s2055_s8 + $0x80] sm:$0xff] }
 0x19f   :  { %2089 = vst [vmem:[#allocation14_spill] sm:$0xff] %v1571_v29  ;;  %v1633_v42 = vld [vmem:[%s2055_s8 + $0x88] sm:$0xff]  ;;  %v1638_v43 = vld [vmem:[%s2055_s8 + $0x90] sm:$0xff]  ;;  %v1643_v44 = vld [vmem:[%s2055_s8 + $0x98] sm:$0xff] }
 0x1a0   :  { %2090 = vst [vmem:[#allocation15_spill] sm:$0xff] %v1576_v30  ;;  %617 = vmatpush.msra.mxu2 %v449_v24  ;;  %v440_v45 = vld [vmem:[%s2054_s7 + $0xb8] sm:$0xff]  ;;  %v1651_v46 = vld [vmem:[%s2055_s8 + $0xa0] sm:$0xff]  ;;  %v1656_v47 = vld [vmem:[%s2055_s8 + $0xa8] sm:$0xff] }
 0x1a1   :  { %2091 = vst [vmem:[#allocation16_spill] sm:$0xff] %v1584_v32  ;;  %v1661_v48 = vld [vmem:[%s2055_s8 + $0xb0] sm:$0xff]  ;;  %v1666_v49 = vld [vmem:[%s2055_s8 + $0xb8] sm:$0xff]  ;;  %v1671_v50 = vld [vmem:[%s2055_s8 + $0xc0] sm:$0xff] }
 0x1a2   :  { %2092 = vst [vmem:[#allocation17_spill] sm:$0xff] %v1600_v35  ;;  %618 = vmatpush.msra.mxu2 %v446_v31  ;;  %v1676_v51 = vld [vmem:[%s2055_s8 + $0xc8] sm:$0xff]  ;;  %v437_v52 = vld [vmem:[%s2054_s7 + $0xa0] sm:$0xff]  ;;  %v1684_v53 = vld [vmem:[%s2055_s8 + $0xd0] sm:$0xff] }
 0x1a3   :  { %v1689_v54 = vld [vmem:[%s2055_s8 + $0xd8] sm:$0xff]  ;;  %v1694_v55 = vld [vmem:[%s2055_s8 + $0xe0] sm:$0xff]  ;;  %v1699_v57 = vld [vmem:[%s2055_s8 + $0xe8] sm:$0xff] }
 0x1a4   :  { %619 = vmatpush.msra.mxu2 %v443_v38  ;;  %v1704_v4 = vld [vmem:[%s2055_s8 + $0xf0] sm:$0xff]  ;;  %v1709_v3 = vld [vmem:[%s2055_s8 + $0xf8] sm:$0xff]  ;;  %v434_v58 = vld [vmem:[%s2054_s7 + $0x88] sm:$0xff] }
 0x1a5   :  { %v1717_v7 = vld [vmem:[%s2055_s8 + $0x100] sm:$0xff]  ;;  %v1722_v56 = vld [vmem:[%s2055_s8 + $0x108] sm:$0xff]  ;;  %v1727_v61 = vld [vmem:[%s2055_s8 + $0x110] sm:$0xff] }
 0x1a6   :  { %620 = vmatpush.msra.mxu2 %v440_v45  ;;  %v1732_v0 = vld [vmem:[%s2055_s8 + $0x118] sm:$0xff]  ;;  %v1737_v2 = vld [vmem:[%s2055_s8 + $0x120] sm:$0xff]  ;;  %v1742_v6 = vld [vmem:[%s2055_s8 + $0x128] sm:$0xff] }
 0x1a7   :  { %v1747_v9 = vld [vmem:[%s2055_s8 + $0x130] sm:$0xff]  ;;  %v1752_v8 = vld [vmem:[%s2055_s8 + $0x138] sm:$0xff]  ;;  %v1757_v5 = vld [vmem:[%s2055_s8 + $0x140] sm:$0xff] }
 0x1a8   :  { %621 = vmatpush.msra.mxu2 %v437_v52  ;;  %v1762_v10 = vld [vmem:[%s2055_s8 + $0x148] sm:$0xff]  ;;  %v1767_v11 = vld [vmem:[%s2055_s8 + $0x150] sm:$0xff]  ;;  %v1772_v1 = vld [vmem:[%s2055_s8 + $0x158] sm:$0xff] }
 0x1a9   :  { %v1777_v62 = vld [vmem:[%s2055_s8 + $0x160] sm:$0xff]  ;;  %v1782_v63 = vld [vmem:[%s2055_s8 + $0x168] sm:$0xff]  ;;  %v1787_v60 = vld [vmem:[%s2055_s8 + $0x170] sm:$0xff] }
 0x1aa   :  { %622 = vmatpush.msra.mxu2 %v434_v58  ;;  %v1792_v12 = vld [vmem:[%s2055_s8 + $0x178] sm:$0xff]  ;;  %v1797_v13 = vld [vmem:[%s2057_s10] sm:$0x1]  ;;  %v1802_v14 = vld [vmem:[%s2054_s7 + $0x110] sm:$0xff] }
 0x1ab   :  { %2093 = vst [vmem:[#allocation18_spill] sm:$0xff] %v1797_v13  ;;  %575 = vmatpush.msra.mxu1 %v1802_v14  ;;  %v431_v15 = vld [vmem:[%s2054_s7 + $0x70] sm:$0xff]  ;;  %v1814_v18 = vld [vmem:[%s2054_s7 + $0xf8] sm:$0xff]  ;;  %v1825_v31 = vld [vmem:[%s2054_s7 + $0xe0] sm:$0xff] }
 0x1ac   :  { %v459_v16 = vld [vmem:[%s2054_s7 + $0x150] sm:$0xff]  ;;  %623 = vmatpush.msra.mxu2 %v431_v15  ;;  %v428_v21 = vld [vmem:[%s2054_s7 + $0x58] sm:$0xff]  ;;  %v425_v38 = vld [vmem:[%s2054_s7 + $0x40] sm:$0xff] }
 0x1ad   :  { %531 = vmatpush.msra.mxu0 %v459_v16  ;;  %v456_v24 = vld [vmem:[%s2054_s7 + $0x138] sm:$0xff]  ;;  %576 = vmatpush.msra.mxu1 %v1814_v18  ;;  %v453_v45 = vld [vmem:[%s2054_s7 + $0x120] sm:$0xff]  ;;  %v1837_v52 = vld [vmem:[%s2054_s7 + $0xc8] sm:$0xff] }
 0x1ae   :  { %881 = vmatpush.msra.mxu3 %v459_v16  ;;  %624 = vmatpush.msra.mxu2 %v428_v21  ;;  %v422_v58 = vld [vmem:[%s2054_s7 + $0x28] sm:$0xff]  ;;  %v1849_v16 = vld [vmem:[%s2054_s7 + $0xb0] sm:$0xff]  ;;  %v1861_v13 = vld [vmem:[%s2054_s7 + $0x98] sm:$0xff] }
 0x1af   :  { %532 = vmatpush.msra.mxu0 %v456_v24  ;;  %577 = vmatpush.msra.mxu1 %v1825_v31  ;;  %v450_v15 = vld [vmem:[%s2054_s7 + $0x108] sm:$0xff]  ;;  %v419_v21 = vld [vmem:[%s2054_s7 + $0x10] sm:$0xff]  ;;  %v444_v25 = vld [vmem:[%s2054_s7 + $0xd8] sm:$0xff] }
 0x1b0   :  { %882 = vmatpush.msra.mxu3 %v456_v24  ;;  %625 = vmatpush.msra.mxu2 %v425_v38  ;;  %v447_v24 = vld [vmem:[%s2054_s7 + $0xf0] sm:$0xff]  ;;  %v515_v38 = vld [vmem:[#allocation3] sm:$0xff]  ;;  %v516_v22 = vld [vmem:[#allocation3 + $0x8] sm:$0xff] }
 0x1b1   :  { %533 = vmatpush.msra.mxu0 %v453_v45  ;;  %578 = vmatpush.msra.mxu1 %v1837_v52  ;;  %v1888_v23 = vld [vmem:[%s2054_s7 + $0x50] sm:$0xff]  ;;  %v1897_v28 = vld [vmem:[%s2054_s7 + $0x38] sm:$0xff]  ;;  %v421_v27 = vld [vmem:[%s2054_s7 + $0x20] sm:$0xff] }
 0x1b2   :  { %883 = vmatpush.msra.mxu3 %v453_v45  ;;  %626 = vmatpush.msra.mxu2 %v422_v58  ;;  %v1870_v45 = vld [vmem:[%s2054_s7 + $0x80] sm:$0xff]  ;;  %v418_v26 = vld [vmem:[%s2054_s7 + $0x8] sm:$0xff]  ;;  %v423_v32 = vld [vmem:[%s2054_s7 + $0x30] sm:$0xff] }
 0x1b3   :  { %534 = vmatpush.msra.mxu0 %v450_v15  ;;  %579 = vmatpush.msra.mxu1 %v1849_v16  ;;  %v441_v58 = vld [vmem:[%s2054_s7 + $0xc0] sm:$0xff]  ;;  %v517_v30 = vld [vmem:[#allocation3 + $0x10] sm:$0xff]  ;;  %v518_v29 = vld [vmem:[#allocation3 + $0x18] sm:$0xff] }
 0x1b4   :  { %884 = vmatpush.msra.mxu3 %v450_v15  ;;  %627 = vmatpush.msra.mxu2 %v419_v21  ;;  %v1879_v15 = vld [vmem:[%s2054_s7 + $0x68] sm:$0xff]  ;;  %v521_v35 = vld [vmem:[#allocation3 + $0x30] sm:$0xff] }
 0x1b5   :  { %535 = vmatpush.msra.mxu0 %v447_v24  ;;  %628 = vmatmul.f32.vlgmr.msra.gmra.mxu2 %v515_v38  ;;  %v438_v21 = vld [vmem:[%s2054_s7 + $0xa8] sm:$0xff] }
 0x1b6   :  { %580 = vmatpush.msra.mxu1 %v1861_v13  ;;  %885 = vmatpush.msra.mxu3 %v447_v24  ;;  %v435_v24 = vld [vmem:[%s2054_s7 + $0x90] sm:$0xff] }
 0x1b7   :  { %536 = vmatpush.msra.mxu0 %v444_v25 }
 0x1b8   :  { %581 = vmatpush.msra.mxu1 %v1870_v45  ;;  %886 = vmatpush.msra.mxu3 %v444_v25  ;;  %v432_v25 = vld [vmem:[%s2054_s7 + $0x78] sm:$0xff] }
 0x1b9   :  { %537 = vmatpush.msra.mxu0 %v441_v58 }
 0x1ba   :  { %582 = vmatpush.msra.mxu1 %v1879_v15  ;;  %887 = vmatpush.msra.mxu3 %v441_v58  ;;  %v429_v58 = vld [vmem:[%s2054_s7 + $0x60] sm:$0xff] }
 0x1bb   :  { %538 = vmatpush.msra.mxu0 %v438_v21 }
 0x1bc   :  { %583 = vmatpush.msra.mxu1 %v1888_v23  ;;  %888 = vmatpush.msra.mxu3 %v438_v21  ;;  %v426_v21 = vld [vmem:[%s2054_s7 + $0x48] sm:$0xff] }
 0x1bd   :  { %539 = vmatpush.msra.mxu0 %v435_v24  ;;  %631 = vmatmul.f32.gmra.mxu2 %v516_v22 }
 0x1be   :  { %584 = vmatpush.msra.mxu1 %v1897_v28  ;;  %889 = vmatpush.msra.mxu3 %v435_v24  ;;  %v420_v24 = vld [vmem:[%s2054_s7 + $0x18] sm:$0xff] }
 0x1bf   :  { %540 = vmatpush.msra.mxu0 %v432_v25 }
 0x1c0   :  { %585 = vmatpush.msra.mxu1 %v421_v27  ;;  %890 = vmatpush.msra.mxu3 %v432_v25  ;;  %v417_v25 = vld [vmem:[%s2054_s7] sm:$0xff] }
 0x1c1   :  { %541 = vmatpush.msra.mxu0 %v429_v58 }
 0x1c2   :  { %586 = vmatpush.msra.mxu1 %v418_v26  ;;  %891 = vmatpush.msra.mxu3 %v429_v58  ;;  %v522_v58 = vld [vmem:[#allocation3 + $0x38] sm:$0xff] }
 0x1c3   :  { %587 = vmatmul.f32.vlgmr.msra.gmra.mxu1 %v515_v38  ;;  %542 = vmatpush.msra.mxu0 %v426_v21 }
 0x1c4   :  { %892 = vmatpush.msra.mxu3 %v426_v21 }
 0x1c5   :  { %543 = vmatpush.msra.mxu0 %v423_v32  ;;  %634 = vmatmul.f32.gmra.mxu2 %v517_v30 }
 0x1c6   :  { %893 = vmatpush.msra.mxu3 %v423_v32  ;;  %v519_v32 = vld [vmem:[#allocation3 + $0x20] sm:$0xff] }
 0x1c7   :  { %544 = vmatpush.msra.mxu0 %v420_v24 }
 0x1c8   :  { %894 = vmatpush.msra.mxu3 %v420_v24 }
 0x1c9   :  { %545 = vmatpush.msra.mxu0 %v417_v25 }
 0x1ca   :  { %546 = vmatmul.f32.vlgmr.msra.gmra.mxu0 %v515_v38  ;;  %895 = vmatpush.msra.mxu3 %v417_v25 }
 0x1cb   :  { %590 = vmatmul.f32.gmra.mxu1 %v516_v22  ;;  %564 = vmatmul.f32.vlgmr.msra.gmra.mxu3 %v521_v35 }
 0x1cc   :  { %896 = vmatpush.msrb.mxu3 %v1506_v59  ;;  %v520_v59 = vld [vmem:[#allocation3 + $0x28] sm:$0xff] }
 0x1cd   :  { %637 = vmatmul.f32.gmra.mxu2 %v518_v29 }
 0x1ce   :  { %897 = vmatpush.msrb.mxu3 %v1515_v17  ;;  %v513_v17 = vld [vmem:[%s2056_s9] sm:$0x7] }
 0x1d0   :  { %898 = vmatpush.msrb.mxu3 %v1523_v19  ;;  %v1942_v19 = vperm.slane %v513_v17, 2 }
 0x1d2   :  { %549 = vmatmul.f32.gmra.mxu0 %v516_v22  ;;  %899 = vmatpush.msrb.mxu3 %v1528_v20 }
 0x1d3   :  { %593 = vmatmul.f32.gmra.mxu1 %v517_v30  ;;  %567 = vmatmul.f32.gmra.mxu3 %v522_v58 }
 0x1d4   :  { %900 = vmatpush.msrb.mxu3 %v1802_v14 }
 0x1d5   :  { %640 = vmatmul.f32.gmra.mxu2 %v519_v32 }
 0x1d6   :  { %901 = vmatpush.msrb.mxu3 %v1814_v18 }
 0x1d8   :  { %902 = vmatpush.msrb.mxu3 %v1825_v31 }
 0x1da   :  { %552 = vmatmul.f32.gmra.mxu0 %v517_v30  ;;  %903 = vmatpush.msrb.mxu3 %v1837_v52  ;;  %v524_v30 = vperm.slane %v513_v17, 0 }
 0x1db   :  { %596 = vmatmul.f32.gmra.mxu1 %v518_v29 }
 0x1dc   :  { %904 = vmatpush.msrb.mxu3 %v1849_v16 }
 0x1dd   :  { %643 = vmatmul.f32.gmra.mxu2 %v520_v59 }
 0x1de   :  { %905 = vmatpush.msrb.mxu3 %v1861_v13 }
 0x1e0   :  { %906 = vmatpush.msrb.mxu3 %v1870_v45 }
 0x1e2   :  { %555 = vmatmul.f32.gmra.mxu0 %v518_v29  ;;  %907 = vmatpush.msrb.mxu3 %v1879_v15 }
 0x1e3   :  { %599 = vmatmul.f32.gmra.mxu1 %v519_v32 }
 0x1e4   :  { %908 = vmatpush.msrb.mxu3 %v1888_v23  ;;  %v1945_v23 = vperm.slane %v513_v17, 1 }
 0x1e5   :  { %646 = vmatmul.f32.gmra.mxu2 %v521_v35 }
 0x1e6   :  { %909 = vmatpush.msrb.mxu3 %v1897_v28 }
 0x1e8   :  { %910 = vmatpush.msrb.mxu3 %v421_v27 }
 0x1ea   :  { %558 = vmatmul.f32.gmra.mxu0 %v519_v32  ;;  %911 = vmatpush.msrb.mxu3 %v418_v26 }
 0x1eb   :  { %602 = vmatmul.f32.gmra.mxu1 %v520_v59  ;;  %608 = vmatmul.f32.vlgmr.msrb.gmra.mxu3 %v522_v58 }
 0x1ed   :  { %649 = vmatmul.f32.gmra.mxu2 %v522_v58 }
 0x1f2   :  { %561 = vmatmul.f32.gmra.mxu0 %v520_v59 }
 0x1f3   :  { %605 = vmatmul.f32.gmra.mxu1 %v521_v35 }
 0x238   :  { %v629_v20 = vpop.f32.mrf.mxu2 }
 0x239   :  { %v630_v22 = vadd.f32 %v629_v20, %v1942_v19 }
 0x23b   :  { %655 = vst [vmem:[#allocation2 + $0x10] sm:$0xff] %v630_v22 }
 0x240   :  { %v588_v27 = vpop.f32.mrf.mxu1  ;;  %v632_v26 = vpop.f32.mrf.mxu2 }
 0x241   :  { %v589_v28 = vadd.f32 %v588_v27, %v1945_v23  ;;  %v633_v29 = vadd.f32 %v632_v26, %v1942_v19 }
 0x243   :  { %654 = vst [vmem:[#allocation2 + $0x8] sm:$0xff] %v589_v28 }
 0x244   :  { %658 = vst [vmem:[#allocation2 + $0x28] sm:$0xff] %v633_v29 }
 0x247   :  { %v547_v35 = vpop.f32.mrf.mxu0 }
 0x248   :  { %v548_v13 = vadd.f32 %v547_v35, %v524_v30  ;;  %v591_v14 = vpop.f32.mrf.mxu1  ;;  %v635_v31 = vpop.f32.mrf.mxu2 }
 0x249   :  { %v592_v18 = vadd.f32 %v591_v14, %v1945_v23  ;;  %v636_v52 = vadd.f32 %v635_v31, %v1942_v19 }
 0x24a   :  { %653 = vst [vmem:[#allocation2] sm:$0xff] %v548_v13 }
 0x24b   :  { %657 = vst [vmem:[#allocation2 + $0x20] sm:$0xff] %v592_v18 }
 0x24c   :  { %661 = vst [vmem:[#allocation2 + $0x40] sm:$0xff] %v636_v52 }
 0x24e   :  { %v565_v24 = vpop.f32.mrf.mxu3 }
 0x24f   :  { %v550_v16 = vpop.f32.mrf.mxu0  ;;  %v566_v32 = vadd.f32 %v565_v24, %v524_v30 }
 0x250   :  { %v551_v38 = vadd.f32 %v550_v16, %v524_v30  ;;  %v594_v45 = vpop.f32.mrf.mxu1  ;;  %v638_v21 = vpop.f32.mrf.mxu2 }
 0x251   :  { %v595_v15 = vadd.f32 %v594_v45, %v1945_v23  ;;  %v639_v25 = vadd.f32 %v638_v21, %v1942_v19  ;;  %671 = vst [vmem:[#allocation2 + $0x90] sm:$0xff] %v566_v32 }
 0x252   :  { %656 = vst [vmem:[#allocation2 + $0x18] sm:$0xff] %v551_v38 }
 0x253   :  { %660 = vst [vmem:[#allocation2 + $0x38] sm:$0xff] %v595_v15 }
 0x254   :  { %664 = vst [vmem:[#allocation2 + $0x58] sm:$0xff] %v639_v25 }
 0x256   :  { %v568_v27 = vpop.f32.mrf.mxu3 }
 0x257   :  { %v553_v58 = vpop.f32.mrf.mxu0  ;;  %v569_v26 = vadd.f32 %v568_v27, %v524_v30 }
 0x258   :  { %v554_v59 = vadd.f32 %v553_v58, %v524_v30  ;;  %v597_v17 = vpop.f32.mrf.mxu1  ;;  %v641_v22 = vpop.f32.mrf.mxu2 }
 0x259   :  { %v598_v20 = vadd.f32 %v597_v17, %v1945_v23  ;;  %v642_v28 = vadd.f32 %v641_v22, %v1942_v19  ;;  %674 = vst [vmem:[#allocation2 + $0xa8] sm:$0xff] %v569_v26 }
 0x25a   :  { %659 = vst [vmem:[#allocation2 + $0x30] sm:$0xff] %v554_v59 }
 0x25b   :  { %663 = vst [vmem:[#allocation2 + $0x50] sm:$0xff] %v598_v20 }
 0x25c   :  { %667 = vst [vmem:[#allocation2 + $0x70] sm:$0xff] %v642_v28 }
 0x25f   :  { %v556_v29 = vpop.f32.mrf.mxu0 }
 0x260   :  { %v557_v35 = vadd.f32 %v556_v29, %v524_v30  ;;  %v600_v13 = vpop.f32.mrf.mxu1  ;;  %v644_v18 = vpop.f32.mrf.mxu2 }
 0x261   :  { %v601_v14 = vadd.f32 %v600_v13, %v1945_v23  ;;  %v645_v31 = vadd.f32 %v644_v18, %v1942_v19 }
 0x262   :  { %662 = vst [vmem:[#allocation2 + $0x48] sm:$0xff] %v557_v35 }
 0x263   :  { %666 = vst [vmem:[#allocation2 + $0x68] sm:$0xff] %v601_v14 }
 0x264   :  { %670 = vst [vmem:[#allocation2 + $0x88] sm:$0xff] %v645_v31 }
 0x267   :  { %v559_v52 = vpop.f32.mrf.mxu0 }
 0x268   :  { %v560_v16 = vadd.f32 %v559_v52, %v524_v30  ;;  %v603_v38 = vpop.f32.mrf.mxu1  ;;  %v647_v15 = vpop.f32.mrf.mxu2 }
 0x269   :  { %v604_v45 = vadd.f32 %v603_v38, %v1945_v23  ;;  %v648_v21 = vadd.f32 %v647_v15, %v1942_v19 }
 0x26a   :  { %665 = vst [vmem:[#allocation2 + $0x60] sm:$0xff] %v560_v16 }
 0x26b   :  { %669 = vst [vmem:[#allocation2 + $0x80] sm:$0xff] %v604_v45 }
 0x26c   :  { %673 = vst [vmem:[#allocation2 + $0xa0] sm:$0xff] %v648_v21 }
 0x26e   :  { %v609_v25 = vpop.f32.mrf.mxu3 }
 0x26f   :  { %v562_v24 = vpop.f32.mrf.mxu0  ;;  %v610_v59 = vadd.f32 %v609_v25, %v1945_v23 }
 0x270   :  { %v563_v32 = vadd.f32 %v562_v24, %v524_v30  ;;  %v606_v58 = vpop.f32.mrf.mxu1  ;;  %v650_v20 = vpop.f32.mrf.mxu2  ;;  %830 = sbr.rel (%p857_p0) target bundleno = 835 (0x343), region = 82 }
 0x271   :  { %v607_v17 = vadd.f32 %v606_v58, %v1945_v23  ;;  %v651_v22 = vadd.f32 %v650_v20, %v1942_v19  ;;  %675 = vst [vmem:[#allocation2 + $0xb0] sm:$0xff] %v610_v59 }
 0x272   :  { %668 = vst [vmem:[#allocation2 + $0x78] sm:$0xff] %v563_v32 }
 0x273   :  { %672 = vst [vmem:[#allocation2 + $0x98] sm:$0xff] %v607_v17 }
 0x274   :  { %676 = vst [vmem:[#allocation2 + $0xb8] sm:$0xff] %v651_v22 }
 0x275 LB: > { %691 = vmatpush.msra.mxu0 %v1782_v63  ;;  %711 = vmatpush.msra.mxu1 %v1787_v60  ;;  %s1977_s18 = sadd.s32 1, %s965_s5   ;;  %v968_v19 = vmov 0   ;;  %v2094_v30 = vld [vmem:[#allocation7_spill] sm:$0xff]  ;;  %v2095_v28 = vld [vmem:[#allocation17_spill] sm:$0xff]  ;;  %v2096_v26 = vld [vmem:[#allocation14_spill] sm:$0xff]  ;;  %s867_s6 = smul.u32 24, %s965_s5  ;;  %s965_s5 = sphi %s1966_s5, %s2106_s5  }
 0x276   : > { %731 = vmatpush.msra.mxu2 %v1792_v12  ;;  %940 = vset.pattern.permute.xlu0 %v968_v19  ;;  %v803_v23 = vstv %s1977_s18  ;;  %v2097_v29 = vld [vmem:[#allocation15_spill] sm:$0xff]  ;;  %v2098_v35 = vld [vmem:[#allocation16_spill] sm:$0xff]  ;;  %v2020_v18 = vld [vmem:[#allocation4] sm:$0xff]  ;;  %p680_p2 = scmp.ge.s32.totalorder %s1977_s18, %s2051_s0  ;;  %s2106_s5 = smov %s1977_s18 }
 0x277   : > { %692 = vmatpush.msra.mxu0 %v1767_v11  ;;  %712 = vmatpush.msra.mxu1 %v1772_v1  ;;  %vm804_vm9 = vcmp.eq.s32.totalorder %v2094_v30, %v803_v23  ;;  %v2099_v13 = vld [vmem:[#allocation11_spill] sm:$0xff]  ;;  %v2100_v14 = vld [vmem:[#allocation12_spill] sm:$0xff]  ;;  %v2101_v31 = vld [vmem:[#allocation13_spill] sm:$0xff]  ;;  %s2030_s19 = scalar_lea.vmem [#allocation2], %s867_s6 }
 0x278   : > { %732 = vmatpush.msra.mxu2 %v1777_v62  ;;  %v806_v27 = vsel %vm804_vm9, 1, %v968_v19  ;;  %v2102_v52 = vld [vmem:[#allocation8_spill] sm:$0xff]  ;;  %v2103_v16 = vld [vmem:[#allocation9_spill] sm:$0xff]  ;;  %v2104_v38 = vld [vmem:[#allocation10_spill] sm:$0xff] }
 0x279   : > { %693 = vmatpush.msra.mxu0 %v1752_v8  ;;  %713 = vmatpush.msra.mxu1 %v1757_v5 }
 0x27a   : > { %733 = vmatpush.msra.mxu2 %v1762_v10  ;;  %808 = vperm.xlu0 %940, %v806_v27  }
 0x27b   : > { %694 = vmatpush.msra.mxu0 %v1737_v2  ;;  %714 = vmatpush.msra.mxu1 %v1742_v6  ;;  %v687_v45 = vld [vmem:[%s2030_s19] sm:$0xff]  ;;  %v688_v15 = vld [vmem:[%s2030_s19 + $0x8] sm:$0xff] }
 0x27c   : > { %734 = vmatpush.msra.mxu2 %v1747_v9 }
 0x27d   : > { %695 = vmatpush.msra.mxu0 %v1722_v56  ;;  %715 = vmatpush.msra.mxu1 %v1727_v61 }
 0x27e   : > { %735 = vmatpush.msra.mxu2 %v1732_v0 }
 0x27f   : > { %696 = vmatpush.msra.mxu0 %v1704_v4  ;;  %716 = vmatpush.msra.mxu1 %v1709_v3 }
 0x280   : > { %736 = vmatpush.msra.mxu2 %v1717_v7 }
 0x281   : > { %697 = vmatpush.msra.mxu0 %v1689_v54  ;;  %717 = vmatpush.msra.mxu1 %v1694_v55 }
 0x282   : > { %737 = vmatpush.msra.mxu2 %v1699_v57 }
 0x283   : > { %698 = vmatpush.msra.mxu0 %v1671_v50  ;;  %718 = vmatpush.msra.mxu1 %v1676_v51 }
 0x284   : > { %738 = vmatpush.msra.mxu2 %v1684_v53 }
 0x285   : > { %699 = vmatpush.msra.mxu0 %v1656_v47  ;;  %719 = vmatpush.msra.mxu1 %v1661_v48 }
 0x286   : > { %739 = vmatpush.msra.mxu2 %v1666_v49 }
 0x287   : > { %700 = vmatpush.msra.mxu0 %v1638_v43  ;;  %720 = vmatpush.msra.mxu1 %v1643_v44 }
 0x288   : > { %740 = vmatpush.msra.mxu2 %v1651_v46 }
 0x289   : > { %701 = vmatpush.msra.mxu0 %v1623_v40  ;;  %721 = vmatpush.msra.mxu1 %v1628_v41 }
 0x28a   : > { %741 = vmatpush.msra.mxu2 %v1633_v42 }
 0x28b   : > { %702 = vmatpush.msra.mxu0 %v1605_v36  ;;  %722 = vmatpush.msra.mxu1 %v1610_v37 }
 0x28c   : > { %742 = vmatpush.msra.mxu2 %v1618_v39 }
 0x28d   : > { %703 = vmatpush.msra.mxu0 %v1589_v33  ;;  %723 = vmatpush.msra.mxu1 %v1594_v34 }
 0x28e   : > { %743 = vmatpush.msra.mxu2 %v2095_v28 }
 0x28f   : > { %704 = vmatpush.msra.mxu0 %v2096_v26  ;;  %724 = vmatpush.msra.mxu1 %v2097_v29  ;;  %v2105_v26 = vld [vmem:[#allocation18_spill] sm:$0xff] }
 0x290   : > { %744 = vmatpush.msra.mxu2 %v2098_v35  ;;  %v792_v29 = vperm.slane %v2105_v26, 0 }
 0x291   : > { %705 = vmatpush.msra.mxu0 %v2099_v13  ;;  %725 = vmatpush.msra.mxu1 %v2100_v14 }
 0x292   : > { %745 = vmatpush.msra.mxu2 %v2101_v31 }
 0x293   : > { %706 = vmatpush.msra.mxu0 %v2102_v52  ;;  %726 = vmatpush.msra.mxu1 %v2103_v16 }
 0x294   : > { %707 = vmatmul.f32.vlgmr.msra.gmra.mxu0 %v2020_v18  ;;  %727 = vmatmul.f32.vlgmr.msra.gmra.mxu1 %v2020_v18 }
 0x295   : > { %746 = vmatpush.msra.mxu2 %v2104_v38 }
 0x296   : > { %747 = vmatmul.f32.vlgmr.msra.gmra.mxu2 %v2020_v18 }
 0x311   : > { %v708_v21 = vpop.f32.mrf.mxu0  ;;  %v728_v24 = vpop.f32.mrf.mxu1 }
 0x312   : > { %v751_v25 = vadd.f32 %v708_v21, %v687_v45  ;;  %v771_v32 = vadd.f32 %v728_v24, %v688_v15  ;;  %v689_v24 = vld [vmem:[%s2030_s19 + $0x10] sm:$0xff] }
 0x314   : > { %v864_v58 = vmul.f32 -1.442695, %v751_v25  ;;  %v865_v59 = vmul.f32 -1.442695, %v771_v32 }
 0x316   : > { %941 = vpow2.f32 %v864_v58 }
 0x317   : > { %943 = vpow2.f32 %v865_v59 }
 0x319   : > { %v748_v13 = vpop.f32.mrf.mxu2 }
 0x31a   : > { %v794_v38 = vadd.f32 %v792_v29, %v748_v13  ;;  %v809_v29 = vpop.permute.xlu0 %808 }
 0x31b   : > { %vm810_vm2 = vcmp.eq.s32.totalorder %v809_v29, 1 }
 0x31c   : > { %v942_v17 = vpop.eup %941 }
 0x31d   : > { %v944_v20 = vpop.eup %943  ;;  %v755_v22 = vadd.f32 1.0, %v942_v17 }
 0x31e   : > { %v775_v19 = vadd.f32 1.0, %v944_v20 }
 0x31f   : > { %945 = vrcp.f32 %v755_v22  ;;  %v767_v14 = vand.u32 2147483648, %v755_v22  ;;  %v765_v52 = vand.u32 2147483647, %v755_v22  ;;  %vm761_vm11 = vweird.f32 %v755_v22 }
 0x320   : > { %947 = vrcp.f32 %v775_v19  ;;  %vm781_vm14 = vweird.f32 %v775_v19  ;;  %v787_v17 = vand.u32 2147483648, %v775_v19 }
 0x321   : > { %v768_v15 = vor.u32 1.1754944e-38, %v767_v14  ;;  %vm766_vm13 = vcmp.eq.f32.partialorder %v765_v52, 8.507059e+37  ;;  %v805_v14 = vld [vmem:[%s2058_s11] sm:$0xff] }
 0x325   : > { %v946_v23 = vpop.eup %945 }
 0x326   : > { %v948_v30 = vpop.eup %947  ;;  %v757_v27 = vmul.f32 %v946_v23, %v755_v22  ;;  %vm762_vm10 = vweird.f32 %v946_v23 }
 0x327   : > { %v777_v35 = vmul.f32 %v948_v30, %v775_v19  ;;  %vm763_vm12 = vmor %vm761_vm11, %vm762_vm10  ;;  %vm782_vm15 = vweird.f32 %v948_v30 }
 0x328   : > { %v758_v28 = vsub.f32 1.0, %v757_v27  ;;  %v785_v27 = vand.u32 2147483647, %v775_v19  ;;  %vm783_vm0 = vmor %vm781_vm14, %vm782_vm15 }
 0x329   : > { %v778_v45 = vsub.f32 1.0, %v777_v35 }
 0x32a   : > { %v759_v31 = vmul.f32 %v946_v23, %v758_v28  ;;  %v788_v28 = vor.u32 1.1754944e-38, %v787_v17  ;;  %vm786_vm1 = vcmp.eq.f32.partialorder %v785_v27, 8.507059e+37 }
 0x32b   : > { %v779_v58 = vmul.f32 %v948_v30, %v778_v45 }
 0x32c   : > { %v760_v16 = vadd.f32 %v946_v23, %v759_v31 }
 0x32d   : > { %v780_v20 = vadd.f32 %v948_v30, %v779_v58 }
 0x32e   : > { %v764_v21 = vsel %vm763_vm12, %v946_v23, %v760_v16 }
 0x32f   : > { %v769_v25 = vsel %vm766_vm13, %v768_v15, %v764_v21  ;;  %v784_v22 = vsel %vm783_vm0, %v948_v30, %v780_v20 }
 0x330   : > { %v795_v32 = vmul.f32 %v794_v38, %v769_v25  ;;  %v789_v35 = vsel %vm786_vm1, %v788_v28, %v784_v22 }
 0x332   : > { %v796_v59 = vadd.f32 %v795_v32, %v689_v24 }
 0x334   : > { %949 = vtanh.f32 %v796_v59 }
 0x33a   : > { %v950_v26 = vpop.eup %949 }
 0x33b   : > { %v798_v23 = vsub.f32 %v2020_v18, %v950_v26 }
 0x33d   : > { %v799_v13 = vmul.f32 %v798_v23, %v789_v35 }
 0x33e   :  { %683 = sbr.rel (!%p680_p2) target bundleno = 629 (0x275), region = 88 }
 0x33f   : > { %v800_v31 = vadd.f32 %v950_v26, %v799_v13 }
 0x341   : > { %801 = vst [vmem:[#allocation4] sm:$0xff] %v800_v31  ;;  %v811_v52 = vsel %vm810_vm2, %v800_v31, %v805_v14 }
 0x342   : > { %812 = vst [vmem:[%s2058_s11] sm:$0xff] %v811_v52 }
 0x343 PF:  {}

</bundles_post_ra>
